<compile_context>
chip_gen: v6e
topology: v6e:2x2x1
jax: 0.10.0
libtpu: 0.0.40
codegen_flags: <defaults>
</compile_context>

<pallas_src>
import functools

import jax
import jax.numpy as jnp
from jax.experimental import pallas as pl
from jax.experimental.pallas import tpu as pltpu


def _round_up(x, m):
    return ((x + m - 1) // m) * m


def _pick_batch_tile(batch, bytes_per_batch_row_step, budget_bytes):
    """Largest divisor of `batch` whose per-step input slab fits the budget.

    Tiling rule: TB must be a multiple of 8 or equal to the full batch.
    Prefers >= 2 batch tiles (v7x dual-TensorCore 'parallel' axis) when the
    batch is large enough.
    """
    def ok(tb):
        return batch % tb == 0 and (tb % 8 == 0 or tb == batch)

    cap = max(1, budget_bytes // max(1, bytes_per_batch_row_step))
    cands = [tb for tb in range(1, batch + 1) if ok(tb) and tb <= cap]
    tb = cands[-1] if cands else batch      # tiny budget: fall back to full batch
    if tb == batch and batch >= 16:
        smaller = [t for t in cands if t <= batch // 2]
        if smaller:
            tb = smaller[-1]                # leave work for the second TC on v7x
    return tb


# ----------------------------- Pallas kernel --------------------------------
def foundation_fwd_kernel(x_ref, w_emb_ref, b_emb_ref, w_proj_ref, b_proj_ref,
                          out_ref, acc_ref, *, patch, inv_n_tokens):
    # x_ref     : (TB, C, RH, W) f32   raw NCHW image rows (RH = row_tile * P)
    # w_emb_ref : (C, P, P, Hp)  bf16  patch-embedding weight, K = (c,py,px)
    # b_emb_ref : (1, Hp)        f32
    # w_proj_ref: (Hp, Dp)       bf16  projection head (Hp/Dp = pad128 dims)
    # b_proj_ref: (1, Dp)        f32
    # out_ref   : (TB, Dp)       f32
    # acc_ref   : (TB, C, P, W)  f32   running strided row-sum (VMEM scratch)
    g = pl.program_id(1)
    tb, ch, rh, width = x_ref.shape
    p = patch

    @pl.when(g == 0)
    def _init():
        acc_ref[...] = jnp.zeros_like(acc_ref)

    # ---- streaming phase: fold image rows by (row % P) --------------------
    # Each (TB, C, P, W) row-group slab is loaded once from the pipelined
    # input tile and added straight into the f32 accumulator, so the step is
    # a single HBM pass with no large live vector values.
    for grp in range(rh // p):
        acc_ref[...] += x_ref[:, :, grp * p:(grp + 1) * p, :]

    # ---- finalize: width fold + mean + two MXU matmuls (once per batch tile)
    @pl.when(g == pl.num_programs(1) - 1)
    def _finalize():
        hp = w_emb_ref.shape[3]
        emb = jnp.zeros((tb, hp), jnp.float32)
        for c in range(ch):
            for py in range(p):
                row = acc_ref[:, c, py, :]                     # (TB, W) f32
                pooled = row[:, 0:p]
                for wg in range(1, width // p):
                    pooled = pooled + row[:, wg * p:(wg + 1) * p]
                pooled = pooled * inv_n_tokens                 # (TB, P) mean
                emb = emb + jnp.dot(pooled.astype(jnp.bfloat16),
                                    w_emb_ref[c, py, :, :],
                                    preferred_element_type=jnp.float32)
        emb = emb + b_emb_ref[...]                             # (TB, Hp) f32
        feats = jnp.dot(emb.astype(jnp.bfloat16), w_proj_ref[...],
                        preferred_element_type=jnp.float32)
        feats = feats + b_proj_ref[...]                        # (TB, Dp) f32
        out_ref[...] = feats.astype(out_ref.dtype)


# ------------------------------- wrapper -------------------------------------
def foundation_model_forward(x, params, patch_size, *, batch_tile=None,
                             row_tile=None, per_step_slab_bytes=12 << 20):
    """x: (B, C, H, W) float32.  Returns (B, D) float32 features."""
    B, C, H, W = x.shape
    P = patch_size
    assert H % P == 0 and W % P == 0
    nh, nw = H // P, W // P
    N = nh * nw
    K = C * P * P

    w_emb, b_emb, w_proj, b_proj = params
    Hdim, D = w_emb.shape[1], w_proj.shape[1]
    assert w_emb.shape[0] == K and w_proj.shape[0] == Hdim

    # ---- weight prep (one-time, tiny): bf16 storage, lane-dense 128 pads ---
    Hp, Dp = _round_up(Hdim, 128), _round_up(D, 128)
    # (K, Hdim) -> (C, P, P, Hp): rows of K are (c, py, px)-major, matching
    # the kernel's per-(c, py) matmul slices.
    w_emb_p = jnp.pad(w_emb.reshape(C, P, P, Hdim),
                      ((0, 0), (0, 0), (0, 0), (0, Hp - Hdim))).astype(jnp.bfloat16)
    b_emb_p = jnp.pad(b_emb, ((0, 0), (0, Hp - Hdim))).astype(jnp.float32)
    w_proj_p = jnp.pad(w_proj, ((0, Hp - Hdim), (0, Dp - D))).astype(jnp.bfloat16)
    b_proj_p = jnp.pad(b_proj, ((0, 0), (0, Dp - D))).astype(jnp.float32)

    # ---- reduction tile over patch rows (second-minor must be %8 or == H) --
    if row_tile is None:
        row_tile = nh
    assert nh % row_tile == 0, "row_tile must divide the number of patch rows"
    RH = row_tile * P
    assert RH % 8 == 0 or RH == H, "rows per step must be a multiple of 8 (or all of H)"

    # ---- batch tile sized against a ~12 MiB per-step input slab (v7x-safe) -
    TB = batch_tile if batch_tile is not None else _pick_batch_tile(
        B, C * RH * W * 4, per_step_slab_bytes)
    assert B % TB == 0 and (TB % 8 == 0 or TB == B), "invalid batch tile"

    grid = (B // TB, nh // row_tile)

    flops = B * C * H * W + B * (2 * K * Hp + 2 * Hp * Dp)
    bytes_accessed = (B * C * H * W * 4                       # single f32 image pass
                      + K * Hp * 2 + Hp * Dp * 2              # bf16 weights (fetched once)
                      + (Hp + Dp) * 4 + B * Dp * 4)           # biases + output

    out_padded = pl.pallas_call(
        functools.partial(foundation_fwd_kernel, patch=P,
                          inv_n_tokens=float(1.0 / N)),
        out_shape=jax.ShapeDtypeStruct((B, Dp), jnp.float32),
        grid_spec=pltpu.PrefetchScalarGridSpec(
            num_scalar_prefetch=0,
            grid=grid,
            in_specs=[
                # raw NCHW rows stream straight from HBM; W stays the lane dim
                pl.BlockSpec((TB, C, RH, W), lambda b, g: (b, 0, g, 0)),
                # constant-index weight blocks: fetched once by the pipeline
                pl.BlockSpec((C, P, P, Hp), lambda b, g: (0, 0, 0, 0)),
                pl.BlockSpec((1, Hp), lambda b, g: (0, 0)),
                pl.BlockSpec((Hp, Dp), lambda b, g: (0, 0)),
                pl.BlockSpec((1, Dp), lambda b, g: (0, 0)),
            ],
            out_specs=pl.BlockSpec((TB, Dp), lambda b, g: (b, 0)),
            scratch_shapes=[pltpu.VMEM((TB, C, P, W), jnp.float32)],
        ),
        compiler_params=pltpu.CompilerParams(
            dimension_semantics=("parallel", "arbitrary"),
            # explicit scoped-VMEM budget: above v5e's 16 MiB default, within
            # v7x's 64 MiB physical VMEM.
            vmem_limit_bytes=48 * 1024 * 1024),
        cost_estimate=pl.CostEstimate(flops=int(flops), transcendentals=0,
                                      bytes_accessed=int(bytes_accessed)),
    )(x.astype(jnp.float32), w_emb_p, b_emb_p, w_proj_p, b_proj_p)

    # drop the zero-padded feature columns
    return out_padded[:, :D]


# ------------------------- deterministic params ------------------------------
def init_params(key, in_dim, hidden, feat_dim):
    k1, k2, k3, k4 = jax.random.split(key, 4)
    w_emb = jax.random.normal(k1, (in_dim, hidden), jnp.float32) * 0.02
    b_emb = jax.random.normal(k2, (1, hidden), jnp.float32) * 0.01
    w_proj = jax.random.normal(k3, (hidden, feat_dim), jnp.float32) * 0.02
    b_proj = jax.random.normal(k4, (1, feat_dim), jnp.float32) * 0.01
    return (w_emb, b_emb, w_proj, b_proj)


# --------------------------- pure-JAX reference -------------------------------
def reference_forward(x, params, patch_size):
    # Pure-f32 reference with the ORIGINAL op order (embed every token, then
    # mean-pool).  The kernel pools first, which is mathematically identical.
    B, C, H, W = x.shape
    P = patch_size
    nh, nw = H // P, W // P
    patches = x.reshape(B, C, nh, P, nw, P).transpose(0, 2, 4, 1, 3, 5)
    patches = patches.reshape(B, nh * nw, C * P * P)
    w_emb, b_emb, w_proj, b_proj = params
    emb = jnp.einsum('bnk,kh->bnh', patches, w_emb) + b_emb
    pooled = emb.mean(axis=1)
    return pooled @ w_proj + b_proj


if __name__ == "__main__":
    # Small shapes consistent with the (B, C, H, W) -> (B, D) contract.
    B, C, H, W = 2, 3, 16, 16
    PATCH = 4
    HIDDEN = 32
    FINAL_FEAT_DIM = 64

    key = jax.random.PRNGKey(0)
    kx, kp = jax.random.split(key)
    x = jax.random.normal(kx, (B, C, H, W), jnp.float32)
    params = init_params(kp, C * PATCH * PATCH, HIDDEN, FINAL_FEAT_DIM)

    # row_tile=2 (of nh=4 patch rows) -> 2-step 'arbitrary' reduction,
    # exercising accumulator init / streaming / finalize paths.
    feats = foundation_model_forward(x, params, PATCH, row_tile=2)
    feats = jax.block_until_ready(feats)

    ref = reference_forward(x, params, PATCH)
    assert feats.shape == (B, FINAL_FEAT_DIM)
    # Weights are stored bf16 in the kernel (f32 accumulation, f32 image
    # stream); reference is pure f32 -> allow bf16-level tolerance.
    assert jnp.allclose(feats, ref, atol=5e-3, rtol=1e-2), (
        float(jnp.max(jnp.abs(feats - ref))))

    print("KERNEL_OK")
</pallas_src>

<mosaic_0001>
module attributes {stable_mosaic.version = 11 : i64} {
  func.func @foundation_fwd_kernel(%arg0: i32, %arg1: i32, %arg2: memref<2x3x8x16xf32, #tpu.memory_space<vmem>>, %arg3: memref<3x4x4x128xbf16, #tpu.memory_space<vmem>>, %arg4: memref<1x128xf32, #tpu.memory_space<vmem>>, %arg5: memref<128x128xbf16, #tpu.memory_space<vmem>>, %arg6: memref<1x128xf32, #tpu.memory_space<vmem>>, %arg7: memref<2x128xf32, #tpu.memory_space<vmem>>, %arg8: memref<2x3x4x16xf32, #tpu.memory_space<vmem>>) attributes {dimension_semantics = [#tpu.dimension_semantics<parallel>, #tpu.dimension_semantics<arbitrary>], iteration_bounds = array<i64: 1, 2>, scalar_prefetch = 0 : i64, scratch_operands = 1 : i64, tpu.core_type = #tpu.core_type<tc>, window_params = [{transform_indices = @transform_0, window_bounds = array<i64: 2, 3, 8, 16>}, {pipeline_mode = #tpu.pipeline_mode<synchronous>, transform_indices = @transform_1, window_bounds = array<i64: 3, 4, 4, 128>}, {pipeline_mode = #tpu.pipeline_mode<synchronous>, transform_indices = @transform_2, window_bounds = array<i64: 1, 128>}, {pipeline_mode = #tpu.pipeline_mode<synchronous>, transform_indices = @transform_3, window_bounds = array<i64: 128, 128>}, {pipeline_mode = #tpu.pipeline_mode<synchronous>, transform_indices = @transform_4, window_bounds = array<i64: 1, 128>}, {transform_indices = @transform_5, window_bounds = array<i64: 2, 128>}]} {
    %c0_i32 = arith.constant 0 : i32
    %0 = arith.cmpi eq, %arg1, %c0_i32 : i32
    %1 = arith.extui %0 : i1 to i32
    %c0_i32_0 = arith.constant 0 : i32
    %2 = arith.cmpi ne, %1, %c0_i32_0 : i32
    scf.if %2 {
      %cst = arith.constant 0.000000e+00 : f32
      %14 = vector.broadcast %cst : f32 to vector<2x3x4x16xf32>
      %c0_24 = arith.constant 0 : index
      %c0_25 = arith.constant 0 : index
      %c0_26 = arith.constant 0 : index
      %c0_27 = arith.constant 0 : index
      %15 = vector.load %arg8[%c0_24, %c0_25, %c0_26, %c0_27] : memref<2x3x4x16xf32, #tpu.memory_space<vmem>>, vector<2x3x4x16xf32>
      tpu.vector_store %arg8[%c0_24, %c0_25, %c0_26, %c0_27], %14 {strides = array<i32>} : memref<2x3x4x16xf32, #tpu.memory_space<vmem>>, vector<2x3x4x16xf32>,
    } else {
    }
    %c0 = arith.constant 0 : index
    %c0_1 = arith.constant 0 : index
    %c0_2 = arith.constant 0 : index
    %c0_3 = arith.constant 0 : index
    %3 = vector.load %arg8[%c0, %c0_1, %c0_2, %c0_3] : memref<2x3x4x16xf32, #tpu.memory_space<vmem>>, vector<2x3x4x16xf32>
    %c0_4 = arith.constant 0 : index
    %c0_5 = arith.constant 0 : index
    %c0_6 = arith.constant 0 : index
    %c0_7 = arith.constant 0 : index
    %4 = vector.load %arg2[%c0_4, %c0_5, %c0_6, %c0_7] : memref<2x3x8x16xf32, #tpu.memory_space<vmem>>, vector<2x3x4x16xf32>
    %5 = arith.addf %3, %4 : vector<2x3x4x16xf32>
    %c0_8 = arith.constant 0 : index
    %c0_9 = arith.constant 0 : index
    %c0_10 = arith.constant 0 : index
    %c0_11 = arith.constant 0 : index
    %6 = vector.load %arg8[%c0_8, %c0_9, %c0_10, %c0_11] : memref<2x3x4x16xf32, #tpu.memory_space<vmem>>, vector<2x3x4x16xf32>
    tpu.vector_store %arg8[%c0_8, %c0_9, %c0_10, %c0_11], %5 {strides = array<i32>} : memref<2x3x4x16xf32, #tpu.memory_space<vmem>>, vector<2x3x4x16xf32>,
    %c0_12 = arith.constant 0 : index
    %c0_13 = arith.constant 0 : index
    %c0_14 = arith.constant 0 : index
    %c0_15 = arith.constant 0 : index
    %7 = vector.load %arg8[%c0_12, %c0_13, %c0_14, %c0_15] : memref<2x3x4x16xf32, #tpu.memory_space<vmem>>, vector<2x3x4x16xf32>
    %c0_16 = arith.constant 0 : index
    %c0_17 = arith.constant 0 : index
    %c4 = arith.constant 4 : index
    %c0_18 = arith.constant 0 : index
    %8 = vector.load %arg2[%c0_16, %c0_17, %c4, %c0_18] : memref<2x3x8x16xf32, #tpu.memory_space<vmem>>, vector<2x3x4x16xf32>
    %9 = arith.addf %7, %8 : vector<2x3x4x16xf32>
    %c0_19 = arith.constant 0 : index
    %c0_20 = arith.constant 0 : index
    %c0_21 = arith.constant 0 : index
    %c0_22 = arith.constant 0 : index
    %10 = vector.load %arg8[%c0_19, %c0_20, %c0_21, %c0_22] : memref<2x3x4x16xf32, #tpu.memory_space<vmem>>, vector<2x3x4x16xf32>
    tpu.vector_store %arg8[%c0_19, %c0_20, %c0_21, %c0_22], %9 {strides = array<i32>} : memref<2x3x4x16xf32, #tpu.memory_space<vmem>>, vector<2x3x4x16xf32>,
    %c1_i32 = arith.constant 1 : i32
    %11 = arith.cmpi eq, %arg1, %c1_i32 : i32
    %12 = arith.extui %11 : i1 to i32
    %c0_i32_23 = arith.constant 0 : i32
    %13 = arith.cmpi ne, %12, %c0_i32_23 : i32
    scf.if %13 {
      %cst = arith.constant 0.000000e+00 : f32
      %14 = vector.broadcast %cst : f32 to vector<2x128xf32>
      %c0_24 = arith.constant 0 : index
      %c0_25 = arith.constant 0 : index
      %c0_26 = arith.constant 0 : index
      %c0_27 = arith.constant 0 : index
      %15 = vector.load %arg8[%c0_24, %c0_25, %c0_26, %c0_27] : memref<2x3x4x16xf32, #tpu.memory_space<vmem>>, vector<2x1x1x16xf32>
      %16 = vector.shape_cast %15 : vector<2x1x1x16xf32> to vector<2x16xf32>
      %17 = vector.extract_strided_slice %16 {offsets = [0, 0], sizes = [2, 4], strides = [1, 1]} : vector<2x16xf32> to vector<2x4xf32>
      %18 = vector.extract_strided_slice %16 {offsets = [0, 4], sizes = [2, 4], strides = [1, 1]} : vector<2x16xf32> to vector<2x4xf32>
      %19 = arith.addf %17, %18 : vector<2x4xf32>
      %20 = vector.extract_strided_slice %16 {offsets = [0, 8], sizes = [2, 4], strides = [1, 1]} : vector<2x16xf32> to vector<2x4xf32>
      %21 = arith.addf %19, %20 : vector<2x4xf32>
      %22 = vector.extract_strided_slice %16 {offsets = [0, 12], sizes = [2, 4], strides = [1, 1]} : vector<2x16xf32> to vector<2x4xf32>
      %23 = arith.addf %21, %22 : vector<2x4xf32>
      %cst_28 = arith.constant 6.250000e-02 : f32
      %24 = vector.broadcast %cst_28 : f32 to vector<2x4xf32>
      %25 = arith.mulf %23, %24 : vector<2x4xf32>
      %26 = arith.truncf %25 : vector<2x4xf32> to vector<2x4xbf16>
      %c0_29 = arith.constant 0 : index
      %c0_30 = arith.constant 0 : index
      %c0_31 = arith.constant 0 : index
      %c0_32 = arith.constant 0 : index
      %27 = vector.load %arg3[%c0_29, %c0_30, %c0_31, %c0_32] : memref<3x4x4x128xbf16, #tpu.memory_space<vmem>>, vector<1x1x4x128xbf16>
      %28 = vector.shape_cast %27 : vector<1x1x4x128xbf16> to vector<4x128xbf16>
      %cst_33 = arith.constant dense<0.000000e+00> : vector<2x128xf32>
      %29 = tpu.matmul %26, %28, %cst_33 {dimension_numbers = #tpu.dot_dimension_numbers<[1], [0], [0], [1], [0, 0, 1, 1], [], []>} : vector<2x4xbf16>, vector<4x128xbf16>, vector<2x128xf32> -> vector<2x128xf32>
      %30 = arith.addf %14, %29 : vector<2x128xf32>
      %c0_34 = arith.constant 0 : index
      %c0_35 = arith.constant 0 : index
      %c1 = arith.constant 1 : index
      %c0_36 = arith.constant 0 : index
      %31 = vector.load %arg8[%c0_34, %c0_35, %c1, %c0_36] : memref<2x3x4x16xf32, #tpu.memory_space<vmem>>, vector<2x1x1x16xf32>
      %32 = vector.shape_cast %31 : vector<2x1x1x16xf32> to vector<2x16xf32>
      %33 = vector.extract_strided_slice %32 {offsets = [0, 0], sizes = [2, 4], strides = [1, 1]} : vector<2x16xf32> to vector<2x4xf32>
      %34 = vector.extract_strided_slice %32 {offsets = [0, 4], sizes = [2, 4], strides = [1, 1]} : vector<2x16xf32> to vector<2x4xf32>
      %35 = arith.addf %33, %34 : vector<2x4xf32>
      %36 = vector.extract_strided_slice %32 {offsets = [0, 8], sizes = [2, 4], strides = [1, 1]} : vector<2x16xf32> to vector<2x4xf32>
      %37 = arith.addf %35, %36 : vector<2x4xf32>
      %38 = vector.extract_strided_slice %32 {offsets = [0, 12], sizes = [2, 4], strides = [1, 1]} : vector<2x16xf32> to vector<2x4xf32>
      %39 = arith.addf %37, %38 : vector<2x4xf32>
      %cst_37 = arith.constant 6.250000e-02 : f32
      %40 = vector.broadcast %cst_37 : f32 to vector<2x4xf32>
      %41 = arith.mulf %39, %40 : vector<2x4xf32>
      %42 = arith.truncf %41 : vector<2x4xf32> to vector<2x4xbf16>
      %c0_38 = arith.constant 0 : index
      %c1_39 = arith.constant 1 : index
      %c0_40 = arith.constant 0 : index
      %c0_41 = arith.constant 0 : index
      %43 = vector.load %arg3[%c0_38, %c1_39, %c0_40, %c0_41] : memref<3x4x4x128xbf16, #tpu.memory_space<vmem>>, vector<1x1x4x128xbf16>
      %44 = vector.shape_cast %43 : vector<1x1x4x128xbf16> to vector<4x128xbf16>
      %cst_42 = arith.constant dense<0.000000e+00> : vector<2x128xf32>
      %45 = tpu.matmul %42, %44, %cst_42 {dimension_numbers = #tpu.dot_dimension_numbers<[1], [0], [0], [1], [0, 0, 1, 1], [], []>} : vector<2x4xbf16>, vector<4x128xbf16>, vector<2x128xf32> -> vector<2x128xf32>
      %46 = arith.addf %30, %45 : vector<2x128xf32>
      %c0_43 = arith.constant 0 : index
      %c0_44 = arith.constant 0 : index
      %c2 = arith.constant 2 : index
      %c0_45 = arith.constant 0 : index
      %47 = vector.load %arg8[%c0_43, %c0_44, %c2, %c0_45] : memref<2x3x4x16xf32, #tpu.memory_space<vmem>>, vector<2x1x1x16xf32>
      %48 = vector.shape_cast %47 : vector<2x1x1x16xf32> to vector<2x16xf32>
      %49 = vector.extract_strided_slice %48 {offsets = [0, 0], sizes = [2, 4], strides = [1, 1]} : vector<2x16xf32> to vector<2x4xf32>
      %50 = vector.extract_strided_slice %48 {offsets = [0, 4], sizes = [2, 4], strides = [1, 1]} : vector<2x16xf32> to vector<2x4xf32>
      %51 = arith.addf %49, %50 : vector<2x4xf32>
      %52 = vector.extract_strided_slice %48 {offsets = [0, 8], sizes = [2, 4], strides = [1, 1]} : vector<2x16xf32> to vector<2x4xf32>
      %53 = arith.addf %51, %52 : vector<2x4xf32>
      %54 = vector.extract_strided_slice %48 {offsets = [0, 12], sizes = [2, 4], strides = [1, 1]} : vector<2x16xf32> to vector<2x4xf32>
      %55 = arith.addf %53, %54 : vector<2x4xf32>
      %cst_46 = arith.constant 6.250000e-02 : f32
      %56 = vector.broadcast %cst_46 : f32 to vector<2x4xf32>
      %57 = arith.mulf %55, %56 : vector<2x4xf32>
      %58 = arith.truncf %57 : vector<2x4xf32> to vector<2x4xbf16>
      %c0_47 = arith.constant 0 : index
      %c2_48 = arith.constant 2 : index
      %c0_49 = arith.constant 0 : index
      %c0_50 = arith.constant 0 : index
      %59 = vector.load %arg3[%c0_47, %c2_48, %c0_49, %c0_50] : memref<3x4x4x128xbf16, #tpu.memory_space<vmem>>, vector<1x1x4x128xbf16>
      %60 = vector.shape_cast %59 : vector<1x1x4x128xbf16> to vector<4x128xbf16>
      %cst_51 = arith.constant dense<0.000000e+00> : vector<2x128xf32>
      %61 = tpu.matmul %58, %60, %cst_51 {dimension_numbers = #tpu.dot_dimension_numbers<[1], [0], [0], [1], [0, 0, 1, 1], [], []>} : vector<2x4xbf16>, vector<4x128xbf16>, vector<2x128xf32> -> vector<2x128xf32>
      %62 = arith.addf %46, %61 : vector<2x128xf32>
      %c0_52 = arith.constant 0 : index
      %c0_53 = arith.constant 0 : index
      %c3 = arith.constant 3 : index
      %c0_54 = arith.constant 0 : index
      %63 = vector.load %arg8[%c0_52, %c0_53, %c3, %c0_54] : memref<2x3x4x16xf32, #tpu.memory_space<vmem>>, vector<2x1x1x16xf32>
      %64 = vector.shape_cast %63 : vector<2x1x1x16xf32> to vector<2x16xf32>
      %65 = vector.extract_strided_slice %64 {offsets = [0, 0], sizes = [2, 4], strides = [1, 1]} : vector<2x16xf32> to vector<2x4xf32>
      %66 = vector.extract_strided_slice %64 {offsets = [0, 4], sizes = [2, 4], strides = [1, 1]} : vector<2x16xf32> to vector<2x4xf32>
      %67 = arith.addf %65, %66 : vector<2x4xf32>
      %68 = vector.extract_strided_slice %64 {offsets = [0, 8], sizes = [2, 4], strides = [1, 1]} : vector<2x16xf32> to vector<2x4xf32>
      %69 = arith.addf %67, %68 : vector<2x4xf32>
      %70 = vector.extract_strided_slice %64 {offsets = [0, 12], sizes = [2, 4], strides = [1, 1]} : vector<2x16xf32> to vector<2x4xf32>
      %71 = arith.addf %69, %70 : vector<2x4xf32>
      %cst_55 = arith.constant 6.250000e-02 : f32
      %72 = vector.broadcast %cst_55 : f32 to vector<2x4xf32>
      %73 = arith.mulf %71, %72 : vector<2x4xf32>
      %74 = arith.truncf %73 : vector<2x4xf32> to vector<2x4xbf16>
      %c0_56 = arith.constant 0 : index
      %c3_57 = arith.constant 3 : index
      %c0_58 = arith.constant 0 : index
      %c0_59 = arith.constant 0 : index
      %75 = vector.load %arg3[%c0_56, %c3_57, %c0_58, %c0_59] : memref<3x4x4x128xbf16, #tpu.memory_space<vmem>>, vector<1x1x4x128xbf16>
      %76 = vector.shape_cast %75 : vector<1x1x4x128xbf16> to vector<4x128xbf16>
      %cst_60 = arith.constant dense<0.000000e+00> : vector<2x128xf32>
      %77 = tpu.matmul %74, %76, %cst_60 {dimension_numbers = #tpu.dot_dimension_numbers<[1], [0], [0], [1], [0, 0, 1, 1], [], []>} : vector<2x4xbf16>, vector<4x128xbf16>, vector<2x128xf32> -> vector<2x128xf32>
      %78 = arith.addf %62, %77 : vector<2x128xf32>
      %c0_61 = arith.constant 0 : index
      %c1_62 = arith.constant 1 : index
      %c0_63 = arith.constant 0 : index
      %c0_64 = arith.constant 0 : index
      %79 = vector.load %arg8[%c0_61, %c1_62, %c0_63, %c0_64] : memref<2x3x4x16xf32, #tpu.memory_space<vmem>>, vector<2x1x1x16xf32>
      %80 = vector.shape_cast %79 : vector<2x1x1x16xf32> to vector<2x16xf32>
      %81 = vector.extract_strided_slice %80 {offsets = [0, 0], sizes = [2, 4], strides = [1, 1]} : vector<2x16xf32> to vector<2x4xf32>
      %82 = vector.extract_strided_slice %80 {offsets = [0, 4], sizes = [2, 4], strides = [1, 1]} : vector<2x16xf32> to vector<2x4xf32>
      %83 = arith.addf %81, %82 : vector<2x4xf32>
      %84 = vector.extract_strided_slice %80 {offsets = [0, 8], sizes = [2, 4], strides = [1, 1]} : vector<2x16xf32> to vector<2x4xf32>
      %85 = arith.addf %83, %84 : vector<2x4xf32>
      %86 = vector.extract_strided_slice %80 {offsets = [0, 12], sizes = [2, 4], strides = [1, 1]} : vector<2x16xf32> to vector<2x4xf32>
      %87 = arith.addf %85, %86 : vector<2x4xf32>
      %cst_65 = arith.constant 6.250000e-02 : f32
      %88 = vector.broadcast %cst_65 : f32 to vector<2x4xf32>
      %89 = arith.mulf %87, %88 : vector<2x4xf32>
      %90 = arith.truncf %89 : vector<2x4xf32> to vector<2x4xbf16>
      %c1_66 = arith.constant 1 : index
      %c0_67 = arith.constant 0 : index
      %c0_68 = arith.constant 0 : index
      %c0_69 = arith.constant 0 : index
      %91 = vector.load %arg3[%c1_66, %c0_67, %c0_68, %c0_69] : memref<3x4x4x128xbf16, #tpu.memory_space<vmem>>, vector<1x1x4x128xbf16>
      %92 = vector.shape_cast %91 : vector<1x1x4x128xbf16> to vector<4x128xbf16>
      %cst_70 = arith.constant dense<0.000000e+00> : vector<2x128xf32>
      %93 = tpu.matmul %90, %92, %cst_70 {dimension_numbers = #tpu.dot_dimension_numbers<[1], [0], [0], [1], [0, 0, 1, 1], [], []>} : vector<2x4xbf16>, vector<4x128xbf16>, vector<2x128xf32> -> vector<2x128xf32>
      %94 = arith.addf %78, %93 : vector<2x128xf32>
      %c0_71 = arith.constant 0 : index
      %c1_72 = arith.constant 1 : index
      %c1_73 = arith.constant 1 : index
      %c0_74 = arith.constant 0 : index
      %95 = vector.load %arg8[%c0_71, %c1_72, %c1_73, %c0_74] : memref<2x3x4x16xf32, #tpu.memory_space<vmem>>, vector<2x1x1x16xf32>
      %96 = vector.shape_cast %95 : vector<2x1x1x16xf32> to vector<2x16xf32>
      %97 = vector.extract_strided_slice %96 {offsets = [0, 0], sizes = [2, 4], strides = [1, 1]} : vector<2x16xf32> to vector<2x4xf32>
      %98 = vector.extract_strided_slice %96 {offsets = [0, 4], sizes = [2, 4], strides = [1, 1]} : vector<2x16xf32> to vector<2x4xf32>
      %99 = arith.addf %97, %98 : vector<2x4xf32>
      %100 = vector.extract_strided_slice %96 {offsets = [0, 8], sizes = [2, 4], strides = [1, 1]} : vector<2x16xf32> to vector<2x4xf32>
      %101 = arith.addf %99, %100 : vector<2x4xf32>
      %102 = vector.extract_strided_slice %96 {offsets = [0, 12], sizes = [2, 4], strides = [1, 1]} : vector<2x16xf32> to vector<2x4xf32>
      %103 = arith.addf %101, %102 : vector<2x4xf32>
      %cst_75 = arith.constant 6.250000e-02 : f32
      %104 = vector.broadcast %cst_75 : f32 to vector<2x4xf32>
      %105 = arith.mulf %103, %104 : vector<2x4xf32>
      %106 = arith.truncf %105 : vector<2x4xf32> to vector<2x4xbf16>
      %c1_76 = arith.constant 1 : index
      %c1_77 = arith.constant 1 : index
      %c0_78 = arith.constant 0 : index
      %c0_79 = arith.constant 0 : index
      %107 = vector.load %arg3[%c1_76, %c1_77, %c0_78, %c0_79] : memref<3x4x4x128xbf16, #tpu.memory_space<vmem>>, vector<1x1x4x128xbf16>
      %108 = vector.shape_cast %107 : vector<1x1x4x128xbf16> to vector<4x128xbf16>
      %cst_80 = arith.constant dense<0.000000e+00> : vector<2x128xf32>
      %109 = tpu.matmul %106, %108, %cst_80 {dimension_numbers = #tpu.dot_dimension_numbers<[1], [0], [0], [1], [0, 0, 1, 1], [], []>} : vector<2x4xbf16>, vector<4x128xbf16>, vector<2x128xf32> -> vector<2x128xf32>
      %110 = arith.addf %94, %109 : vector<2x128xf32>
      %c0_81 = arith.constant 0 : index
      %c1_82 = arith.constant 1 : index
      %c2_83 = arith.constant 2 : index
      %c0_84 = arith.constant 0 : index
      %111 = vector.load %arg8[%c0_81, %c1_82, %c2_83, %c0_84] : memref<2x3x4x16xf32, #tpu.memory_space<vmem>>, vector<2x1x1x16xf32>
      %112 = vector.shape_cast %111 : vector<2x1x1x16xf32> to vector<2x16xf32>
      %113 = vector.extract_strided_slice %112 {offsets = [0, 0], sizes = [2, 4], strides = [1, 1]} : vector<2x16xf32> to vector<2x4xf32>
      %114 = vector.extract_strided_slice %112 {offsets = [0, 4], sizes = [2, 4], strides = [1, 1]} : vector<2x16xf32> to vector<2x4xf32>
      %115 = arith.addf %113, %114 : vector<2x4xf32>
      %116 = vector.extract_strided_slice %112 {offsets = [0, 8], sizes = [2, 4], strides = [1, 1]} : vector<2x16xf32> to vector<2x4xf32>
      %117 = arith.addf %115, %116 : vector<2x4xf32>
      %118 = vector.extract_strided_slice %112 {offsets = [0, 12], sizes = [2, 4], strides = [1, 1]} : vector<2x16xf32> to vector<2x4xf32>
      %119 = arith.addf %117, %118 : vector<2x4xf32>
      %cst_85 = arith.constant 6.250000e-02 : f32
      %120 = vector.broadcast %cst_85 : f32 to vector<2x4xf32>
      %121 = arith.mulf %119, %120 : vector<2x4xf32>
      %122 = arith.truncf %121 : vector<2x4xf32> to vector<2x4xbf16>
      %c1_86 = arith.constant 1 : index
      %c2_87 = arith.constant 2 : index
      %c0_88 = arith.constant 0 : index
      %c0_89 = arith.constant 0 : index
      %123 = vector.load %arg3[%c1_86, %c2_87, %c0_88, %c0_89] : memref<3x4x4x128xbf16, #tpu.memory_space<vmem>>, vector<1x1x4x128xbf16>
      %124 = vector.shape_cast %123 : vector<1x1x4x128xbf16> to vector<4x128xbf16>
      %cst_90 = arith.constant dense<0.000000e+00> : vector<2x128xf32>
      %125 = tpu.matmul %122, %124, %cst_90 {dimension_numbers = #tpu.dot_dimension_numbers<[1], [0], [0], [1], [0, 0, 1, 1], [], []>} : vector<2x4xbf16>, vector<4x128xbf16>, vector<2x128xf32> -> vector<2x128xf32>
      %126 = arith.addf %110, %125 : vector<2x128xf32>
      %c0_91 = arith.constant 0 : index
      %c1_92 = arith.constant 1 : index
      %c3_93 = arith.constant 3 : index
      %c0_94 = arith.constant 0 : index
      %127 = vector.load %arg8[%c0_91, %c1_92, %c3_93, %c0_94] : memref<2x3x4x16xf32, #tpu.memory_space<vmem>>, vector<2x1x1x16xf32>
      %128 = vector.shape_cast %127 : vector<2x1x1x16xf32> to vector<2x16xf32>
      %129 = vector.extract_strided_slice %128 {offsets = [0, 0], sizes = [2, 4], strides = [1, 1]} : vector<2x16xf32> to vector<2x4xf32>
      %130 = vector.extract_strided_slice %128 {offsets = [0, 4], sizes = [2, 4], strides = [1, 1]} : vector<2x16xf32> to vector<2x4xf32>
      %131 = arith.addf %129, %130 : vector<2x4xf32>
      %132 = vector.extract_strided_slice %128 {offsets = [0, 8], sizes = [2, 4], strides = [1, 1]} : vector<2x16xf32> to vector<2x4xf32>
      %133 = arith.addf %131, %132 : vector<2x4xf32>
      %134 = vector.extract_strided_slice %128 {offsets = [0, 12], sizes = [2, 4], strides = [1, 1]} : vector<2x16xf32> to vector<2x4xf32>
      %135 = arith.addf %133, %134 : vector<2x4xf32>
      %cst_95 = arith.constant 6.250000e-02 : f32
      %136 = vector.broadcast %cst_95 : f32 to vector<2x4xf32>
      %137 = arith.mulf %135, %136 : vector<2x4xf32>
      %138 = arith.truncf %137 : vector<2x4xf32> to vector<2x4xbf16>
      %c1_96 = arith.constant 1 : index
      %c3_97 = arith.constant 3 : index
      %c0_98 = arith.constant 0 : index
      %c0_99 = arith.constant 0 : index
      %139 = vector.load %arg3[%c1_96, %c3_97, %c0_98, %c0_99] : memref<3x4x4x128xbf16, #tpu.memory_space<vmem>>, vector<1x1x4x128xbf16>
      %140 = vector.shape_cast %139 : vector<1x1x4x128xbf16> to vector<4x128xbf16>
      %cst_100 = arith.constant dense<0.000000e+00> : vector<2x128xf32>
      %141 = tpu.matmul %138, %140, %cst_100 {dimension_numbers = #tpu.dot_dimension_numbers<[1], [0], [0], [1], [0, 0, 1, 1], [], []>} : vector<2x4xbf16>, vector<4x128xbf16>, vector<2x128xf32> -> vector<2x128xf32>
      %142 = arith.addf %126, %141 : vector<2x128xf32>
      %c0_101 = arith.constant 0 : index
      %c2_102 = arith.constant 2 : index
      %c0_103 = arith.constant 0 : index
      %c0_104 = arith.constant 0 : index
      %143 = vector.load %arg8[%c0_101, %c2_102, %c0_103, %c0_104] : memref<2x3x4x16xf32, #tpu.memory_space<vmem>>, vector<2x1x1x16xf32>
      %144 = vector.shape_cast %143 : vector<2x1x1x16xf32> to vector<2x16xf32>
      %145 = vector.extract_strided_slice %144 {offsets = [0, 0], sizes = [2, 4], strides = [1, 1]} : vector<2x16xf32> to vector<2x4xf32>
      %146 = vector.extract_strided_slice %144 {offsets = [0, 4], sizes = [2, 4], strides = [1, 1]} : vector<2x16xf32> to vector<2x4xf32>
      %147 = arith.addf %145, %146 : vector<2x4xf32>
      %148 = vector.extract_strided_slice %144 {offsets = [0, 8], sizes = [2, 4], strides = [1, 1]} : vector<2x16xf32> to vector<2x4xf32>
      %149 = arith.addf %147, %148 : vector<2x4xf32>
      %150 = vector.extract_strided_slice %144 {offsets = [0, 12], sizes = [2, 4], strides = [1, 1]} : vector<2x16xf32> to vector<2x4xf32>
      %151 = arith.addf %149, %150 : vector<2x4xf32>
      %cst_105 = arith.constant 6.250000e-02 : f32
      %152 = vector.broadcast %cst_105 : f32 to vector<2x4xf32>
      %153 = arith.mulf %151, %152 : vector<2x4xf32>
      %154 = arith.truncf %153 : vector<2x4xf32> to vector<2x4xbf16>
      %c2_106 = arith.constant 2 : index
      %c0_107 = arith.constant 0 : index
      %c0_108 = arith.constant 0 : index
      %c0_109 = arith.constant 0 : index
      %155 = vector.load %arg3[%c2_106, %c0_107, %c0_108, %c0_109] : memref<3x4x4x128xbf16, #tpu.memory_space<vmem>>, vector<1x1x4x128xbf16>
      %156 = vector.shape_cast %155 : vector<1x1x4x128xbf16> to vector<4x128xbf16>
      %cst_110 = arith.constant dense<0.000000e+00> : vector<2x128xf32>
      %157 = tpu.matmul %154, %156, %cst_110 {dimension_numbers = #tpu.dot_dimension_numbers<[1], [0], [0], [1], [0, 0, 1, 1], [], []>} : vector<2x4xbf16>, vector<4x128xbf16>, vector<2x128xf32> -> vector<2x128xf32>
      %158 = arith.addf %142, %157 : vector<2x128xf32>
      %c0_111 = arith.constant 0 : index
      %c2_112 = arith.constant 2 : index
      %c1_113 = arith.constant 1 : index
      %c0_114 = arith.constant 0 : index
      %159 = vector.load %arg8[%c0_111, %c2_112, %c1_113, %c0_114] : memref<2x3x4x16xf32, #tpu.memory_space<vmem>>, vector<2x1x1x16xf32>
      %160 = vector.shape_cast %159 : vector<2x1x1x16xf32> to vector<2x16xf32>
      %161 = vector.extract_strided_slice %160 {offsets = [0, 0], sizes = [2, 4], strides = [1, 1]} : vector<2x16xf32> to vector<2x4xf32>
      %162 = vector.extract_strided_slice %160 {offsets = [0, 4], sizes = [2, 4], strides = [1, 1]} : vector<2x16xf32> to vector<2x4xf32>
      %163 = arith.addf %161, %162 : vector<2x4xf32>
      %164 = vector.extract_strided_slice %160 {offsets = [0, 8], sizes = [2, 4], strides = [1, 1]} : vector<2x16xf32> to vector<2x4xf32>
      %165 = arith.addf %163, %164 : vector<2x4xf32>
      %166 = vector.extract_strided_slice %160 {offsets = [0, 12], sizes = [2, 4], strides = [1, 1]} : vector<2x16xf32> to vector<2x4xf32>
      %167 = arith.addf %165, %166 : vector<2x4xf32>
      %cst_115 = arith.constant 6.250000e-02 : f32
      %168 = vector.broadcast %cst_115 : f32 to vector<2x4xf32>
      %169 = arith.mulf %167, %168 : vector<2x4xf32>
      %170 = arith.truncf %169 : vector<2x4xf32> to vector<2x4xbf16>
      %c2_116 = arith.constant 2 : index
      %c1_117 = arith.constant 1 : index
      %c0_118 = arith.constant 0 : index
      %c0_119 = arith.constant 0 : index
      %171 = vector.load %arg3[%c2_116, %c1_117, %c0_118, %c0_119] : memref<3x4x4x128xbf16, #tpu.memory_space<vmem>>, vector<1x1x4x128xbf16>
      %172 = vector.shape_cast %171 : vector<1x1x4x128xbf16> to vector<4x128xbf16>
      %cst_120 = arith.constant dense<0.000000e+00> : vector<2x128xf32>
      %173 = tpu.matmul %170, %172, %cst_120 {dimension_numbers = #tpu.dot_dimension_numbers<[1], [0], [0], [1], [0, 0, 1, 1], [], []>} : vector<2x4xbf16>, vector<4x128xbf16>, vector<2x128xf32> -> vector<2x128xf32>
      %174 = arith.addf %158, %173 : vector<2x128xf32>
      %c0_121 = arith.constant 0 : index
      %c2_122 = arith.constant 2 : index
      %c2_123 = arith.constant 2 : index
      %c0_124 = arith.constant 0 : index
      %175 = vector.load %arg8[%c0_121, %c2_122, %c2_123, %c0_124] : memref<2x3x4x16xf32, #tpu.memory_space<vmem>>, vector<2x1x1x16xf32>
      %176 = vector.shape_cast %175 : vector<2x1x1x16xf32> to vector<2x16xf32>
      %177 = vector.extract_strided_slice %176 {offsets = [0, 0], sizes = [2, 4], strides = [1, 1]} : vector<2x16xf32> to vector<2x4xf32>
      %178 = vector.extract_strided_slice %176 {offsets = [0, 4], sizes = [2, 4], strides = [1, 1]} : vector<2x16xf32> to vector<2x4xf32>
      %179 = arith.addf %177, %178 : vector<2x4xf32>
      %180 = vector.extract_strided_slice %176 {offsets = [0, 8], sizes = [2, 4], strides = [1, 1]} : vector<2x16xf32> to vector<2x4xf32>
      %181 = arith.addf %179, %180 : vector<2x4xf32>
      %182 = vector.extract_strided_slice %176 {offsets = [0, 12], sizes = [2, 4], strides = [1, 1]} : vector<2x16xf32> to vector<2x4xf32>
      %183 = arith.addf %181, %182 : vector<2x4xf32>
      %cst_125 = arith.constant 6.250000e-02 : f32
      %184 = vector.broadcast %cst_125 : f32 to vector<2x4xf32>
      %185 = arith.mulf %183, %184 : vector<2x4xf32>
      %186 = arith.truncf %185 : vector<2x4xf32> to vector<2x4xbf16>
      %c2_126 = arith.constant 2 : index
      %c2_127 = arith.constant 2 : index
      %c0_128 = arith.constant 0 : index
      %c0_129 = arith.constant 0 : index
      %187 = vector.load %arg3[%c2_126, %c2_127, %c0_128, %c0_129] : memref<3x4x4x128xbf16, #tpu.memory_space<vmem>>, vector<1x1x4x128xbf16>
      %188 = vector.shape_cast %187 : vector<1x1x4x128xbf16> to vector<4x128xbf16>
      %cst_130 = arith.constant dense<0.000000e+00> : vector<2x128xf32>
      %189 = tpu.matmul %186, %188, %cst_130 {dimension_numbers = #tpu.dot_dimension_numbers<[1], [0], [0], [1], [0, 0, 1, 1], [], []>} : vector<2x4xbf16>, vector<4x128xbf16>, vector<2x128xf32> -> vector<2x128xf32>
      %190 = arith.addf %174, %189 : vector<2x128xf32>
      %c0_131 = arith.constant 0 : index
      %c2_132 = arith.constant 2 : index
      %c3_133 = arith.constant 3 : index
      %c0_134 = arith.constant 0 : index
      %191 = vector.load %arg8[%c0_131, %c2_132, %c3_133, %c0_134] : memref<2x3x4x16xf32, #tpu.memory_space<vmem>>, vector<2x1x1x16xf32>
      %192 = vector.shape_cast %191 : vector<2x1x1x16xf32> to vector<2x16xf32>
      %193 = vector.extract_strided_slice %192 {offsets = [0, 0], sizes = [2, 4], strides = [1, 1]} : vector<2x16xf32> to vector<2x4xf32>
      %194 = vector.extract_strided_slice %192 {offsets = [0, 4], sizes = [2, 4], strides = [1, 1]} : vector<2x16xf32> to vector<2x4xf32>
      %195 = arith.addf %193, %194 : vector<2x4xf32>
      %196 = vector.extract_strided_slice %192 {offsets = [0, 8], sizes = [2, 4], strides = [1, 1]} : vector<2x16xf32> to vector<2x4xf32>
      %197 = arith.addf %195, %196 : vector<2x4xf32>
      %198 = vector.extract_strided_slice %192 {offsets = [0, 12], sizes = [2, 4], strides = [1, 1]} : vector<2x16xf32> to vector<2x4xf32>
      %199 = arith.addf %197, %198 : vector<2x4xf32>
      %cst_135 = arith.constant 6.250000e-02 : f32
      %200 = vector.broadcast %cst_135 : f32 to vector<2x4xf32>
      %201 = arith.mulf %199, %200 : vector<2x4xf32>
      %202 = arith.truncf %201 : vector<2x4xf32> to vector<2x4xbf16>
      %c2_136 = arith.constant 2 : index
      %c3_137 = arith.constant 3 : index
      %c0_138 = arith.constant 0 : index
      %c0_139 = arith.constant 0 : index
      %203 = vector.load %arg3[%c2_136, %c3_137, %c0_138, %c0_139] : memref<3x4x4x128xbf16, #tpu.memory_space<vmem>>, vector<1x1x4x128xbf16>
      %204 = vector.shape_cast %203 : vector<1x1x4x128xbf16> to vector<4x128xbf16>
      %cst_140 = arith.constant dense<0.000000e+00> : vector<2x128xf32>
      %205 = tpu.matmul %202, %204, %cst_140 {dimension_numbers = #tpu.dot_dimension_numbers<[1], [0], [0], [1], [0, 0, 1, 1], [], []>} : vector<2x4xbf16>, vector<4x128xbf16>, vector<2x128xf32> -> vector<2x128xf32>
      %206 = arith.addf %190, %205 : vector<2x128xf32>
      %c0_141 = arith.constant 0 : index
      %c0_142 = arith.constant 0 : index
      %207 = vector.load %arg4[%c0_141, %c0_142] : memref<1x128xf32, #tpu.memory_space<vmem>>, vector<1x128xf32>
      %208 = vector.broadcast %207 : vector<1x128xf32> to vector<2x128xf32>
      %209 = arith.addf %206, %208 : vector<2x128xf32>
      %210 = arith.truncf %209 : vector<2x128xf32> to vector<2x128xbf16>
      %c0_143 = arith.constant 0 : index
      %c0_144 = arith.constant 0 : index
      %211 = vector.load %arg5[%c0_143, %c0_144] : memref<128x128xbf16, #tpu.memory_space<vmem>>, vector<128x128xbf16>
      %cst_145 = arith.constant dense<0.000000e+00> : vector<2x128xf32>
      %212 = tpu.matmul %210, %211, %cst_145 {dimension_numbers = #tpu.dot_dimension_numbers<[1], [0], [0], [1], [0, 0, 1, 1], [], []>} : vector<2x128xbf16>, vector<128x128xbf16>, vector<2x128xf32> -> vector<2x128xf32>
      %c0_146 = arith.constant 0 : index
      %c0_147 = arith.constant 0 : index
      %213 = vector.load %arg6[%c0_146, %c0_147] : memref<1x128xf32, #tpu.memory_space<vmem>>, vector<1x128xf32>
      %214 = vector.broadcast %213 : vector<1x128xf32> to vector<2x128xf32>
      %215 = arith.addf %212, %214 : vector<2x128xf32>
      %c0_148 = arith.constant 0 : index
      %c0_149 = arith.constant 0 : index
      %216 = vector.load %arg7[%c0_148, %c0_149] : memref<2x128xf32, #tpu.memory_space<vmem>>, vector<2x128xf32>
      tpu.vector_store %arg7[%c0_148, %c0_149], %215 {strides = array<i32>} : memref<2x128xf32, #tpu.memory_space<vmem>>, vector<2x128xf32>,
    } else {
    }
    return
  }
  func.func @transform_0(%arg0: i32, %arg1: i32) -> (i32, i32, i32, i32) {
    %c0_i32 = arith.constant 0 : i32
    %c0_i32_0 = arith.constant 0 : i32
    %c0_i32_1 = arith.constant 0 : i32
    return %arg0, %c0_i32, %arg1, %c0_i32_0 : i32, i32, i32, i32
  }
  func.func @transform_1(%arg0: i32, %arg1: i32) -> (i32, i32, i32, i32) {
    %c0_i32 = arith.constant 0 : i32
    %c0_i32_0 = arith.constant 0 : i32
    %c0_i32_1 = arith.constant 0 : i32
    %c0_i32_2 = arith.constant 0 : i32
    %c0_i32_3 = arith.constant 0 : i32
    return %c0_i32, %c0_i32_0, %c0_i32_1, %c0_i32_2 : i32, i32, i32, i32
  }
  func.func @transform_2(%arg0: i32, %arg1: i32) -> (i32, i32) {
    %c0_i32 = arith.constant 0 : i32
    %c0_i32_0 = arith.constant 0 : i32
    %c0_i32_1 = arith.constant 0 : i32
    return %c0_i32, %c0_i32_0 : i32, i32
  }
  func.func @transform_3(%arg0: i32, %arg1: i32) -> (i32, i32) {
    %c0_i32 = arith.constant 0 : i32
    %c0_i32_0 = arith.constant 0 : i32
    %c0_i32_1 = arith.constant 0 : i32
    return %c0_i32, %c0_i32_0 : i32, i32
  }
  func.func @transform_4(%arg0: i32, %arg1: i32) -> (i32, i32) {
    %c0_i32 = arith.constant 0 : i32
    %c0_i32_0 = arith.constant 0 : i32
    %c0_i32_1 = arith.constant 0 : i32
    return %c0_i32, %c0_i32_0 : i32, i32
  }
  func.func @transform_5(%arg0: i32, %arg1: i32) -> (i32, i32) {
    %c0_i32 = arith.constant 0 : i32
    %c0_i32_0 = arith.constant 0 : i32
    return %arg0, %c0_i32 : i32, i32
  }
}

</mosaic_0001>

<bundles_post_ra>
// kernel: tpu_custom_call.1
= control target key start
LH: loop header
LB: loop body
LE: loop exit
PB: predicated region body
PF: predicated region fallthrough
CT: control target
= control target key end

     0   :  { %10 = vsyncpa [#allocation4], 0  ;;  %s2577_s0 = inlined_call_operand.hbm [shape: f32[2,3,16,16], index: 0, kind: input, shape index: {}]   ;;  %s2578_s1 = inlined_call_operand.hbm [shape: bf16[3,4,4,128], index: 1, kind: input, shape index: {}]   ;;  %s2579_s2 = inlined_call_operand.vmem [shape: f32[1,128], index: 2, kind: input, shape index: {}]   ;;  %s2580_s3 = inlined_call_operand.hbm [shape: bf16[128,128], index: 3, kind: input, shape index: {}]   ;;  %s2581_s4 = inlined_call_operand.vmem [shape: f32[1,128], index: 4, kind: input, shape index: {}]   ;;  %s2582_s5 = inlined_call_operand.hbm [shape: f32[2,128], index: 5, kind: output, shape index: {}]  }
   0x1   :  { %12 = vsyncpa [#allocation4 + $0x1], 0 }
   0x2   :  { %13 = vsyncpa [#allocation7], 0 }
   0x3   :  { %14 = vsyncpa [#allocation5], 0  ;;  %s2096_s18 = smov 0   ;;  %s2098_s19 = smov 0  }
   0x4   :  { %s2100_s20 = smov 0   ;;  %s2102_s21 = smov 0  }
   0x5   :  { %s2104_s22 = smov 0   ;;  %s2106_s23 = smov 0  }
   0x6 LB: > { %s2585_s24 = sadd.s32 4294967295, %s2047_s23   ;;  %p48_p0 = scmp.ne.s32.totalorder %s2035_s20, %s2031_s19  ;;  %s2047_s23 = sphi %s2106_s23, %s20_s23   ;;  %s2043_s22 = sphi %s2104_s22, %s2598_s22   ;;  %s2039_s21 = sphi %s2102_s21, %s2597_s21   ;;  %s2035_s20 = sphi %s2100_s20, %s2596_s20   ;;  %s2031_s19 = sphi %s2098_s19, %s2595_s19   ;;  %s2027_s18 = sphi %s2096_s18, %s2594_s18  }
   0x7   : > { %p49_p1 = scmp.eq.s32.totalorder %s2047_s23, 0  ;;  %p54_p2 = scmp.ne.s32.totalorder %s2031_s19, %s2027_s18 }
   0x8   : > { %p2131_p3 = scmp.eq.s32.totalorder %s2585_s24, 0  ;;  %p1618_p4 = scmp.ge.s32.totalorder %s2047_s23, 1 }
   0x9   : > { %p50_p5 = por %p49_p1, %p48_p0  ;;  %p175_p6 = scmp.lt.s32.totalorder %s2047_s23, 3 }
   0xa   : > { %s2586_s25 = scalar_select %p2131_p3, 1, 0 }
   0xb   : > { %p2139_p7 = por %p2131_p3, %p54_p2  ;;  %p2143_p8 = pnand %p1618_p4, %p175_p6 }
   0xc   : > { %s2049_s28 = smov [#allocation6]   ;;  %p1808_p11 = scmp.lt.s32.totalorder %s2047_s23, 2 }
   0xd   : > { %s187_s29 = sshll.u32 %s2049_s28, 4  ;;  %p1795_p9 = pneg %p2143_p8  ;;  %s188_s29 = int_to_ptr.vmem [resolvable:$true] %s187_s29 }
   0xe   : > { %p2156_p12 = pnand %p1808_p11, %p50_p5  ;;  %s1896_s7 = scalar_lea.vmem %s188_s29, 384 }
   0xf   : > { %p2151_p10 = pnand %p1795_p9, %p2131_p3  ;;  %p1897_p0 = scmp.ne.s32.totalorder %s188_s29, %s1896_s7 }
  0x10   : > { %p1904_p4 = scmp.lt.s32.totalorder %s188_s29, %s188_s29  ;;  %p1905_p6 = scmp.lt.s32.totalorder %s1896_s7, %s1896_s7 }
  0x11   : > { %p1887_p13 = pneg %p2151_p10 }
  0x12   : > { %p1906_p9 = por %p1905_p6, %p1904_p4 }
  0x13   : > { %p1899_p1 = pnand %p1897_p0, %p1887_p13 }
  0x15   : > { %p1900_p2 = pneg %p1899_p1 }
  0x17   : > { %p1907_p3 = pnand %p1906_p9, %p1900_p2 }
  0x19   : > { %1910 = shalt.err (!%p1907_p3)
}
  0x1a   : > { %s2050_s8 = smov 32   ;;  %s2051_s9 = smov 2  }
  0x1b   : > { %1798 = dma.hbm_to_vmem [thread:$0]  (!%p2151_p10), %s2578_s1, 384, %s188_s29, [#allocation7], %s2050_s8, %s2050_s8, %s2051_s9  }
  0x1c   : > { %s2052_s12 = smov [#allocation8]  }
  0x1d   : > { %s203_s13 = sshll.u32 %s2052_s12, 4  ;;  %s204_s13 = int_to_ptr.vmem [resolvable:$true] %s203_s13 }
  0x1e   : > { %s1922_s14 = scalar_lea.vmem %s204_s13, 1024  ;;  %p1930_p1 = scmp.lt.s32.totalorder %s204_s13, %s204_s13 }
  0x1f   : > { %p1923_p5 = scmp.ne.s32.totalorder %s204_s13, %s1922_s14  ;;  %p1931_p3 = scmp.lt.s32.totalorder %s1922_s14, %s1922_s14 }
  0x21   : > { %p1925_p11 = pnand %p1923_p5, %p1887_p13  ;;  %p1932_p2 = por %p1931_p3, %p1930_p1 }
  0x23   : > { %p1926_p0 = pneg %p1925_p11 }
  0x25   : > { %p1933_p4 = pnand %p1932_p2, %p1926_p0 }
  0x27   : > { %1936 = shalt.err (!%p1933_p4)
}
  0x28   : > { %s2053_s15 = smov 64   ;;  %s2054_s16 = smov 4  }
  0x29   : > { %1801 = dma.hbm_to_vmem [thread:$0]  (!%p2151_p10), %s2580_s3, 1024, %s204_s13, [#allocation7], %s2053_s15, %s2053_s15, %s2054_s16  }
  0x2a   : > { %s41_s28 = sadd.s32 1, %s2035_s20  ;;  %s220_s29 = sand.u32 1, %s2035_s20  }
  0x2b   : > { %s29_s7 = sadd.s32 1, %s2043_s22  ;;  %s1779_s8 = smul.u32 48, %s220_s29 }
  0x2c   : > { %p30_p13 = scmp.ge.s32.totalorder %s29_s7, 2  ;;  %s1622_s9 = sshll.u32 %s2043_s22, 7 }
  0x2d   : > { %s2187_s12 = scalar_lea.hbm %s2577_s0, %s1622_s9  ;;  %s224_s14 = scalar_lea.vmem [#allocation3], %s1779_s8 }
  0x2e   : > { %s2600_s7 = smov (%p30_p13, %s29_s7), 0  ;;  %s233_s24 = sshll.u32 %s224_s14, 4  ;;  %s234_s24 = int_to_ptr.vmem [resolvable:$true] %s233_s24 }
  0x2f   : > { %s37_s30 = ssub.s32 %s2043_s22, %s2600_s7  ;;  %s221_s15 = scalar_lea.sflag [#allocation4], %s220_s29 }
  0x30   : > { %p39_p6 = scmp.eq.s32.totalorder %s37_s30, 0  ;;  %p1939_p10 = pneg %p2156_p12 }
  0x31   : > { %s1950_s16 = scalar_lea.vmem %s234_s24, 768  ;;  %s2055_s17 = smov [#allocation3]  }
  0x32   : > { %s2192_s13 = scalar_select %p39_p6, %s2035_s20, %s41_s28  }
  0x33   : > { %p1951_p9 = scmp.ne.s32.totalorder %s234_s24, %s1950_s16  ;;  %s1955_s18 = sshll.u32 %s2055_s17, 4  ;;  %s1956_s18 = int_to_ptr.vmem [resolvable:$false] %s1955_s18 }
  0x34   : > { %s1957_s10 = scalar_lea.vmem %s1956_s18, 1536  ;;  %p1958_p0 = scmp.lt.s32.totalorder %s234_s24, %s1956_s18 }
  0x35   : > { %p1953_p5 = pnand %p1951_p9, %p1939_p10  ;;  %p1959_p1 = scmp.lt.s32.totalorder %s1957_s10, %s1950_s16 }
  0x37   : > { %p1954_p11 = pneg %p1953_p5  ;;  %p1960_p3 = por %p1959_p1, %p1958_p0 }
  0x39   : > { %p1961_p2 = pnand %p1960_p3, %p1954_p11 }
  0x3b   : > { %1964 = shalt.err (!%p1961_p2)
}
  0x3c   : > { %s2056_s8 = smov 256   ;;  %s2057_s28 = smov 128  }
  0x3d   : > { %s2058_s29 = smov 8   ;;  %245 = sbr.rel (%p2143_p8) target bundleno = 789 (0x315), region = 40 }
  0x3e   : > { %1805 = dma.hbm_to_vmem [thread:$0]  (!%p2156_p12), %s2187_s12, 768, %s234_s24, %s221_s15, %s2056_s8, %s2057_s28, %s2058_s29  }
  0x3f   : > { %s247_s9 = sand.u32 (!%p2143_p8), 1, %s2031_s19  }
  0x40   : > { %s1780_s11 = smul.u32 (!%p2143_p8), 48, %s247_s9  ;;  %s248_s30 = scalar_lea.sflag (!%p2143_p8), [#allocation4], %s247_s9 }
  0x42   : > { %s2202_s14 = scalar_lea.vmem [#allocation3], %s1780_s11 }
  0x43   : > { %2014 = dma.done.wait (%p2139_p7), %s248_s30, 768  }
  0x44   : > { %2016 = vsyncadd (%p2139_p7), %s248_s30, 4294966528  ;;  %p2591_p4 = scmp.ne.s32.totalorder %s2586_s25, 0 }
  0x46   : > { %2018 = dma.done.wait (%p2591_p4), [#allocation7], 1408  }
  0x47   : > { %2020 = vsyncadd (%p2591_p4), [#allocation7], 4294965888  ;;  %p1626_p8 = scmp.ne.s32.totalorder %s2039_s21, 0 }
  0x49   : > { %286 = sbr.rel (%p1626_p8) target bundleno = 82 (0x52), region = 56 }
  0x4e   : > { %vm287_vm0 = vcmask 125952   ;;  %v2059_v0 = vmov 0.0  }
  0x4f   : > { %288 = vst.msk [vmem:[#allocation2] sm:$0xf] %vm287_vm0, %v2059_v0  ;;  %289 = vst.msk [vmem:[#allocation2 + $0x4] sm:$0xf] %vm287_vm0, %v2059_v0 }
  0x50   : > { %290 = vst.msk [vmem:[#allocation2 + $0x8] sm:$0xf] %vm287_vm0, %v2059_v0  ;;  %291 = vst.msk [vmem:[#allocation2 + $0xc] sm:$0xf] %vm287_vm0, %v2059_v0 }
  0x51   : > { %292 = vst.msk [vmem:[#allocation2 + $0x10] sm:$0xf] %vm287_vm0, %v2059_v0  ;;  %293 = vst.msk [vmem:[#allocation2 + $0x14] sm:$0xf] %vm287_vm0, %v2059_v0 }
  0x52 PF: > { %v300_v2 = vld [vmem:[%s2202_s14] sm:$0xf]  ;;  %vm312_vm1 = vcmask 125952   ;;  %v301_v5 = vld [vmem:[%s2202_s14 + $0x8] sm:$0xf]  ;;  %p1627_p7 = scmp.ne.s32.totalorder %s2039_s21, 1 }
  0x53   : > { %v302_v8 = vld [vmem:[%s2202_s14 + $0x10] sm:$0xf]  ;;  %v303_v10 = vld [vmem:[%s2202_s14 + $0x18] sm:$0xf]  ;;  %v304_v14 = vld [vmem:[%s2202_s14 + $0x20] sm:$0xf] }
  0x54   : > { %v305_v17 = vld [vmem:[%s2202_s14 + $0x28] sm:$0xf]  ;;  %v325_v19 = vld [vmem:[%s2202_s14 + $0x4] sm:$0xf]  ;;  %v326_v20 = vld [vmem:[%s2202_s14 + $0xc] sm:$0xf] }
  0x55   : > { %v327_v22 = vld [vmem:[%s2202_s14 + $0x14] sm:$0xf]  ;;  %v328_v23 = vld [vmem:[%s2202_s14 + $0x1c] sm:$0xf]  ;;  %v329_v26 = vld [vmem:[%s2202_s14 + $0x24] sm:$0xf] }
  0x56   : > { %v294_v1 = vld [vmem:[#allocation2] sm:$0xf]  ;;  %v295_v4 = vld [vmem:[#allocation2 + $0x4] sm:$0xf]  ;;  %s2060_s24 = smov (!%p1627_p7), 120   ;;  %s2061_s25 = smov (!%p1627_p7), 124  }
  0x57   : > { %v306_v3 = vadd.f32 %v300_v2, %v294_v1  ;;  %v296_v6 = vld [vmem:[#allocation2 + $0x8] sm:$0xf]  ;;  %v307_v7 = vadd.f32 %v301_v5, %v295_v4  ;;  %v297_v9 = vld [vmem:[#allocation2 + $0xc] sm:$0xf]  ;;  %v330_v30 = vld [vmem:[%s2202_s14 + $0x2c] sm:$0xf] }
  0x58   : > { %v308_v11 = vadd.f32 %v302_v8, %v296_v6  ;;  %v309_v12 = vadd.f32 %v303_v10, %v297_v9  ;;  %v298_v13 = vld [vmem:[#allocation2 + $0x10] sm:$0xf]  ;;  %v299_v15 = vld [vmem:[#allocation2 + $0x14] sm:$0xf]  ;;  %s2062_s21 = smov (!%p1627_p7), 116  }
  0x59   : > { %313 = vst.msk [vmem:[#allocation2] sm:$0xf] %vm312_vm1, %v306_v3  ;;  %314 = vst.msk [vmem:[#allocation2 + $0x4] sm:$0xf] %vm312_vm1, %v307_v7  ;;  %v310_v16 = vadd.f32 %v304_v14, %v298_v13  ;;  %v311_v18 = vadd.f32 %v305_v17, %v299_v15 }
  0x5a   : > { %315 = vst.msk [vmem:[#allocation2 + $0x8] sm:$0xf] %vm312_vm1, %v308_v11  ;;  %316 = vst.msk [vmem:[#allocation2 + $0xc] sm:$0xf] %vm312_vm1, %v309_v12 }
  0x5b   : > { %317 = vst.msk [vmem:[#allocation2 + $0x10] sm:$0xf] %vm312_vm1, %v310_v16  ;;  %318 = vst.msk [vmem:[#allocation2 + $0x14] sm:$0xf] %vm312_vm1, %v311_v18 }
  0x60   : > { %v319_v21 = vld [vmem:[#allocation2] sm:$0xf]  ;;  %v320_v25 = vld [vmem:[#allocation2 + $0x4] sm:$0xf] }
  0x61   : > { %v331_v24 = vadd.f32 %v325_v19, %v319_v21  ;;  %v332_v27 = vadd.f32 %v326_v20, %v320_v25  ;;  %v321_v28 = vld [vmem:[#allocation2 + $0x8] sm:$0xf]  ;;  %v322_v29 = vld [vmem:[#allocation2 + $0xc] sm:$0xf]  ;;  %346 = sbr.rel (%p1627_p7) target bundleno = 774 (0x306), region = 60 }
  0x62   : > { %v333_v31 = vadd.f32 %v327_v22, %v321_v28  ;;  %v334_v32 = vadd.f32 %v328_v23, %v322_v29  ;;  %v323_v33 = vld [vmem:[#allocation2 + $0x10] sm:$0xf]  ;;  %v324_v35 = vld [vmem:[#allocation2 + $0x14] sm:$0xf] }
  0x63   : > { %337 = vst.msk [vmem:[#allocation2] sm:$0xf] %vm312_vm1, %v331_v24  ;;  %338 = vst.msk [vmem:[#allocation2 + $0x4] sm:$0xf] %vm312_vm1, %v332_v27  ;;  %v335_v34 = vadd.f32 %v329_v26, %v323_v33  ;;  %v336_v36 = vadd.f32 %v330_v30, %v324_v35 }
  0x64   : > { %339 = vst.msk [vmem:[#allocation2 + $0x8] sm:$0xf] %vm312_vm1, %v333_v31  ;;  %340 = vst.msk [vmem:[#allocation2 + $0xc] sm:$0xf] %vm312_vm1, %v334_v32 }
  0x65   : > { %341 = vst.msk [vmem:[#allocation2 + $0x10] sm:$0xf] %vm312_vm1, %v335_v34  ;;  %342 = vst.msk [vmem:[#allocation2 + $0x14] sm:$0xf] %vm312_vm1, %v336_v36 }
  0x66   : > { %v413_v41 = vld [vmem:[#allocation6 + $0x2] sm:$0x3]  ;;  %vm426_vm2 = vcmask 1041408   ;;  %v2063_v42 = vmov 0.0   ;;  %vm2064_vm3 = vmmov 0   ;;  %vm419_vm4 = vcmask 1041409  }
  0x67   : > { %1687 = vmatprep.subr.bf16.mxu1 %v2063_v42  ;;  %v428_v43 = vsel %vm426_vm2, %v413_v41, 0  ;;  %1689 = vmatprep.mubr.msk.bf16.mxu1 %vm2064_vm3, %v2063_v42  ;;  %v733_v52 = vld [vmem:[#allocation6 + $0x8] sm:$0x3]  ;;  %v379_v27 = vld [vmem:[#allocation6] sm:$0x3]  ;;  %vm422_vm5 = vcmask 31744  }
  0x68   : > { %1688 = vmatpush3.bf16.msra.mxu1 %v428_v43  ;;  %1711 = vmatprep.subr.bf16.mxu0 %v2063_v42  ;;  %v745_v53 = vsel %vm426_vm2, %v733_v52, 0  ;;  %v481_v34 = vsel %vm426_vm2, %v379_v27, 0 }
  0x69   : > { %1693 = vmatprep.subr.bf16.mxu1 %v2063_v42  ;;  %1713 = vmatprep.mubr.msk.bf16.mxu0 %vm2064_vm3, %v2063_v42 }
  0x6a   : > { %v2244_v38 = vld [vmem:[#allocation2 + $0x1] sm:$0x1]  ;;  %v2256_v40 = vld [vmem:[#allocation2] sm:$0x1]  ;;  %v2280_v45 = vld [vmem:[#allocation2 + $0x2] sm:$0x1]  ;;  %1712 = vmatpush3.bf16.msra.mxu0 %v745_v53 }
  0x6b   : > { %v2238_v37 = vld [vmem:[#allocation2 + $0xd] sm:$0x1]  ;;  %v2250_v39 = vld [vmem:[#allocation2 + $0xc] sm:$0x1]  ;;  %v2278_v44 = vld [vmem:[#allocation2 + $0xe] sm:$0x1]  ;;  %1723 = vmatprep.subr.bf16.mxu0 %v2063_v42 }
  0x6c   : > { %394 = vrot.lane.b32.xlu1 %v2238_v37, %s2060_s24  ;;  %386 = vrot.lane.b32.xlu0 %v2238_v37, %s2061_s25  ;;  %v2294_v46 = vld [vmem:[#allocation2 + $0xf] sm:$0x1]  ;;  %v2296_v47 = vld [vmem:[#allocation2 + $0x3] sm:$0x1]  ;;  %v2310_v48 = vld [vmem:[#allocation2 + $0x10] sm:$0x1] }
  0x6d   : > { %v2312_v49 = vld [vmem:[#allocation2 + $0x4] sm:$0x1]  ;;  %v2318_v50 = vld [vmem:[#allocation2 + $0x11] sm:$0x1]  ;;  %v2328_v51 = vld [vmem:[#allocation2 + $0x5] sm:$0x1] }
  0x6e   : > { %v2344_v54 = vld [vmem:[#allocation2 + $0x12] sm:$0x1]  ;;  %v2346_v55 = vld [vmem:[#allocation2 + $0x6] sm:$0x1]  ;;  %v2352_v56 = vld [vmem:[#allocation2 + $0x13] sm:$0x1] }
  0x6f   : > { %v2362_v57 = vld [vmem:[#allocation2 + $0x7] sm:$0x1]  ;;  %v2376_v58 = vld [vmem:[#allocation2 + $0x14] sm:$0x1]  ;;  %v2378_v59 = vld [vmem:[#allocation2 + $0x8] sm:$0x1] }
  0x70   : > { %392 = vrot.lane.b32.xlu1 %v2244_v38, %s2060_s24  ;;  %384 = vrot.lane.b32.xlu0 %v2244_v38, %s2061_s25  ;;  %v2384_v60 = vld [vmem:[#allocation2 + $0x15] sm:$0x1]  ;;  %v2394_v61 = vld [vmem:[#allocation2 + $0x9] sm:$0x1]  ;;  %v2409_v1 = vld [vmem:[#allocation2 + $0x16] sm:$0x1] }
  0x71   : > { %v2411_v2 = vld [vmem:[#allocation2 + $0xa] sm:$0x1]  ;;  %v2418_v8 = vld [vmem:[#allocation2 + $0x17] sm:$0x1]  ;;  %v2429_v21 = vld [vmem:[#allocation2 + $0xb] sm:$0x1] }
  0x74   : > { %400 = vrot.lane.b32.xlu1 %v2244_v38, %s2062_s21  ;;  %402 = vrot.lane.b32.xlu0 %v2238_v37, %s2062_s21 }
  0x78   : > { %353 = vrot.lane.b32.xlu0 %v2250_v39, %s2061_s25  ;;  %351 = vrot.lane.b32.xlu1 %v2256_v40, %s2061_s25 }
  0x7c   : > { %361 = vrot.lane.b32.xlu0 %v2250_v39, %s2060_s24  ;;  %359 = vrot.lane.b32.xlu1 %v2256_v40, %s2060_s24 }
  0x80   : > { %369 = vrot.lane.b32.xlu0 %v2250_v39, %s2062_s21  ;;  %367 = vrot.lane.b32.xlu1 %v2256_v40, %s2062_s21 }
  0x84   : > { %529 = vrot.lane.b32.xlu0 %v2278_v44, %s2061_s25  ;;  %527 = vrot.lane.b32.xlu1 %v2280_v45, %s2061_s25 }
  0x88   : > { %537 = vrot.lane.b32.xlu0 %v2278_v44, %s2060_s24  ;;  %535 = vrot.lane.b32.xlu1 %v2280_v45, %s2060_s24 }
  0x8c   : > { %545 = vrot.lane.b32.xlu0 %v2278_v44, %s2062_s21  ;;  %543 = vrot.lane.b32.xlu1 %v2280_v45, %s2062_s21 }
  0x90   : > { %617 = vrot.lane.b32.xlu0 %v2294_v46, %s2061_s25  ;;  %615 = vrot.lane.b32.xlu1 %v2296_v47, %s2061_s25 }
  0x94   : > { %625 = vrot.lane.b32.xlu0 %v2294_v46, %s2060_s24  ;;  %623 = vrot.lane.b32.xlu1 %v2296_v47, %s2060_s24 }
  0x98   : > { %633 = vrot.lane.b32.xlu0 %v2294_v46, %s2062_s21  ;;  %631 = vrot.lane.b32.xlu1 %v2296_v47, %s2062_s21 }
  0x9c   : > { %706 = vrot.lane.b32.xlu0 %v2310_v48, %s2061_s25  ;;  %704 = vrot.lane.b32.xlu1 %v2312_v49, %s2061_s25 }
  0xa0   : > { %714 = vrot.lane.b32.xlu0 %v2310_v48, %s2060_s24  ;;  %794 = vrot.lane.b32.xlu1 %v2318_v50, %s2061_s25 }
  0xa4   : > { %712 = vrot.lane.b32.xlu0 %v2312_v49, %s2060_s24  ;;  %722 = vrot.lane.b32.xlu1 %v2310_v48, %s2062_s21 }
  0xa8   : > { %792 = vrot.lane.b32.xlu0 %v2328_v51, %s2061_s25  ;;  %802 = vrot.lane.b32.xlu1 %v2318_v50, %s2060_s24 }
  0xac   : > { %720 = vrot.lane.b32.xlu0 %v2312_v49, %s2062_s21  ;;  %800 = vrot.lane.b32.xlu1 %v2328_v51, %s2060_s24 }
  0xb0   : > { %810 = vrot.lane.b32.xlu0 %v2318_v50, %s2062_s21  ;;  %808 = vrot.lane.b32.xlu1 %v2328_v51, %s2062_s21 }
  0xb4   : > { %882 = vrot.lane.b32.xlu0 %v2344_v54, %s2061_s25  ;;  %880 = vrot.lane.b32.xlu1 %v2346_v55, %s2061_s25 }
  0xb8   : > { %890 = vrot.lane.b32.xlu0 %v2344_v54, %s2060_s24  ;;  %970 = vrot.lane.b32.xlu1 %v2352_v56, %s2061_s25 }
  0xbc   : > { %888 = vrot.lane.b32.xlu0 %v2346_v55, %s2060_s24  ;;  %898 = vrot.lane.b32.xlu1 %v2344_v54, %s2062_s21 }
  0xc0   : > { %968 = vrot.lane.b32.xlu0 %v2362_v57, %s2061_s25  ;;  %978 = vrot.lane.b32.xlu1 %v2352_v56, %s2060_s24 }
  0xc4   : > { %896 = vrot.lane.b32.xlu0 %v2346_v55, %s2062_s21  ;;  %976 = vrot.lane.b32.xlu1 %v2362_v57, %s2060_s24 }
  0xc8   : > { %986 = vrot.lane.b32.xlu0 %v2352_v56, %s2062_s21  ;;  %984 = vrot.lane.b32.xlu1 %v2362_v57, %s2062_s21 }
  0xcc   : > { %1059 = vrot.lane.b32.xlu0 %v2376_v58, %s2061_s25  ;;  %1057 = vrot.lane.b32.xlu1 %v2378_v59, %s2061_s25 }
  0xd0   : > { %1067 = vrot.lane.b32.xlu0 %v2376_v58, %s2060_s24  ;;  %1147 = vrot.lane.b32.xlu1 %v2384_v60, %s2061_s25 }
  0xd4   : > { %1065 = vrot.lane.b32.xlu0 %v2378_v59, %s2060_s24  ;;  %1075 = vrot.lane.b32.xlu1 %v2376_v58, %s2062_s21 }
  0xd8   : > { %1145 = vrot.lane.b32.xlu0 %v2394_v61, %s2061_s25  ;;  %1155 = vrot.lane.b32.xlu1 %v2384_v60, %s2060_s24 }
  0xdc   : > { %1073 = vrot.lane.b32.xlu0 %v2378_v59, %s2062_s21  ;;  %1153 = vrot.lane.b32.xlu1 %v2394_v61, %s2060_s24 }
  0xde   : > { %v395_v62 = vpop.permute.xlu1 %394  ;;  %v387_v63 = vpop.permute.xlu0 %386 }
  0xdf   : > { %v391_v0 = vadd.f32 %v387_v63, %v2238_v37 }
  0xe0   : > { %1163 = vrot.lane.b32.xlu0 %v2384_v60, %s2062_s21  ;;  %1161 = vrot.lane.b32.xlu1 %v2394_v61, %s2062_s21 }
  0xe1   : > { %v399_v7 = vadd.f32 %v395_v62, %v391_v0 }
  0xe2   : > { %v393_v3 = vpop.permute.xlu1 %392  ;;  %v385_v4 = vpop.permute.xlu0 %384 }
  0xe3   : > { %v390_v5 = vadd.f32 %v385_v4, %v2244_v38 }
  0xe4   : > { %1235 = vrot.lane.b32.xlu0 %v2409_v1, %s2061_s25  ;;  %1233 = vrot.lane.b32.xlu1 %v2411_v2, %s2061_s25 }
  0xe5   : > { %v398_v6 = vadd.f32 %v393_v3, %v390_v5  ;;  %v556_v5 = vld [vmem:[#allocation6 + $0x4] sm:$0x3] }
  0xe6   : > { %v401_v9 = vpop.permute.xlu1 %400  ;;  %v403_v10 = vpop.permute.xlu0 %402 }
  0xe7   : > { %v406_v11 = vadd.f32 %v401_v9, %v398_v6  ;;  %v407_v12 = vadd.f32 %v403_v10, %v399_v7 }
  0xe8   : > { %1243 = vrot.lane.b32.xlu0 %v2409_v1, %s2060_s24  ;;  %1323 = vrot.lane.b32.xlu1 %v2418_v8, %s2061_s25 }
  0xe9   : > { %v408_v13 = vmul.f32 0.0625, %v406_v11  ;;  %v409_v14 = vmul.f32 0.0625, %v407_v12 }
  0xea   : > { %v354_v15 = vpop.permute.xlu0 %353  ;;  %v352_v16 = vpop.permute.xlu1 %351 }
  0xeb   : > { %v410_v17 = vpack.c.bf16 %v408_v13, %v408_v13  ;;  %v411_v18 = vpack.c.bf16 %v409_v14, %v409_v14  ;;  %v357_v20 = vadd.f32 %v352_v16, %v2256_v40  ;;  %v358_v26 = vadd.f32 %v354_v15, %v2250_v39 }
  0xec   : > { %1241 = vrot.lane.b32.xlu0 %v2411_v2, %s2060_s24  ;;  %1251 = vrot.lane.b32.xlu1 %v2409_v1, %s2062_s21  ;;  %v568_v13 = vsel %vm426_vm2, %v556_v5, 0 }
  0xed   : > { %v417_v19 = vunpack.c.l.b16 %v411_v18  ;;  %v416_v24 = vunpack.c.l.b16 %v410_v17 }
  0xee   : > { %v362_v22 = vpop.permute.xlu0 %361  ;;  %v360_v23 = vpop.permute.xlu1 %359 }
  0xef   : > { %v418_v25 = vrot.slane %v417_v19, 7  ;;  %v366_v29 = vadd.f32 %v362_v22, %v358_v26  ;;  %v365_v30 = vadd.f32 %v360_v23, %v357_v20 }
  0xf0   : > { %1321 = vrot.lane.b32.xlu0 %v2429_v21, %s2061_s25  ;;  %1331 = vrot.lane.b32.xlu1 %v2418_v8, %s2060_s24 }
  0xf1   : > { %v420_v28 = vsel %vm419_vm4, %v418_v25, %v416_v24 }
  0xf2   : > { %v421_v31 = vpack.c.b16 %v420_v28, %v420_v28  ;;  %v370_v32 = vpop.permute.xlu0 %369  ;;  %v368_v33 = vpop.permute.xlu1 %367  ;;  %v644_v28 = vld [vmem:[#allocation6 + $0x6] sm:$0x3] }
  0xf3   : > { %v374_v35 = vadd.f32 %v370_v32, %v366_v29  ;;  %v373_v36 = vadd.f32 %v368_v33, %v365_v30 }
  0xf4   : > { %1690 = vmatmul.mubr.msk.bf16.vlgmr.msra.gmra.mxu1 %vm422_vm5, %v421_v31  ;;  %1249 = vrot.lane.b32.xlu0 %v2411_v2, %s2062_s21 }
  0xf5   : > { %v376_v37 = vmul.f32 0.0625, %v374_v35  ;;  %v375_v38 = vmul.f32 0.0625, %v373_v36  ;;  %1329 = vrot.lane.b32.xlu1 %v2429_v21, %s2060_s24  ;;  %1694 = vmatpush3.bf16.msra.mxu1 %v481_v34  ;;  %v656_v35 = vsel %vm426_vm2, %v644_v28, 0 }
  0xf6   : > { %v530_v39 = vpop.permute.xlu0 %529  ;;  %v528_v40 = vpop.permute.xlu1 %527  ;;  %1695 = vmatprep.mubr.msk.bf16.mxu1 %vm2064_vm3, %v2063_v42  ;;  %1699 = vmatprep.subr.bf16.mxu1 %v2063_v42 }
  0xf7   : > { %v378_v41 = vpack.c.bf16 %v376_v37, %v376_v37  ;;  %v377_v43 = vpack.c.bf16 %v375_v38, %v375_v38  ;;  %v533_v53 = vadd.f32 %v528_v40, %v2280_v45  ;;  %v534_v4 = vadd.f32 %v530_v39, %v2278_v44 }
  0xf8   : > { %1339 = vrot.lane.b32.xlu0 %v2418_v8, %s2062_s21 }
  0xf9   : > { %v473_v52 = vunpack.c.l.b16 %v378_v41  ;;  %1337 = vrot.lane.b32.xlu1 %v2429_v21, %s2062_s21  ;;  %v472_v3 = vunpack.c.l.b16 %v377_v43 }
  0xfa   : > { %v538_v62 = vpop.permute.xlu0 %537  ;;  %v536_v63 = vpop.permute.xlu1 %535 }
  0xfb   : > { %v474_v0 = vrot.slane %v473_v52, 7  ;;  %v542_v7 = vadd.f32 %v538_v62, %v534_v4  ;;  %v541_v9 = vadd.f32 %v536_v63, %v533_v53 }
  0xfd   : > { %v475_v6 = vsel %vm419_vm4, %v474_v0, %v472_v3  ;;  %v821_v3 = vld [vmem:[#allocation6 + $0xa] sm:$0x3] }
  0xfe   : > { %v476_v10 = vpack.c.b16 %v475_v6, %v475_v6  ;;  %v546_v11 = vpop.permute.xlu0 %545  ;;  %v544_v12 = vpop.permute.xlu1 %543 }
  0xff   : > { %v550_v45 = vadd.f32 %v546_v11, %v542_v7  ;;  %v549_v14 = vadd.f32 %v544_v12, %v541_v9 }
 0x100   : > { %1696 = vmatmul.mubr.msk.bf16.vlgmr.msra.gmra.mxu1 %vm422_vm5, %v476_v10  ;;  %v833_v10 = vsel %vm426_vm2, %v821_v3, 0 }
 0x101   : > { %v552_v15 = vmul.f32 0.0625, %v550_v45  ;;  %v551_v16 = vmul.f32 0.0625, %v549_v14  ;;  %1700 = vmatpush3.bf16.msra.mxu1 %v568_v13  ;;  %1701 = vmatprep.mubr.msk.bf16.mxu1 %vm2064_vm3, %v2063_v42 }
 0x102   : > { %v618_v44 = vpop.permute.xlu0 %617  ;;  %v616_v17 = vpop.permute.xlu1 %615  ;;  %1705 = vmatprep.subr.bf16.mxu1 %v2063_v42 }
 0x103   : > { %v554_v18 = vpack.c.bf16 %v552_v15, %v552_v15  ;;  %v553_v19 = vpack.c.bf16 %v551_v16, %v551_v16  ;;  %v621_v22 = vadd.f32 %v616_v17, %v2296_v47  ;;  %v622_v27 = vadd.f32 %v618_v44, %v2294_v46 }
 0x105   : > { %v560_v20 = vunpack.c.l.b16 %v554_v18  ;;  %v559_v26 = vunpack.c.l.b16 %v553_v19 }
 0x106   : > { %v626_v23 = vpop.permute.xlu0 %625  ;;  %v624_v24 = vpop.permute.xlu1 %623 }
 0x107   : > { %v561_v25 = vrot.slane %v560_v20, 7  ;;  %v630_v30 = vadd.f32 %v626_v23, %v622_v27  ;;  %v629_v31 = vadd.f32 %v624_v24, %v621_v22 }
 0x109   : > { %v562_v29 = vsel %vm419_vm4, %v561_v25, %v559_v26 }
 0x10a   : > { %v563_v32 = vpack.c.b16 %v562_v29, %v562_v29  ;;  %v634_v33 = vpop.permute.xlu0 %633  ;;  %v632_v34 = vpop.permute.xlu1 %631 }
 0x10b   : > { %v638_v36 = vadd.f32 %v634_v33, %v630_v30  ;;  %v637_v37 = vadd.f32 %v632_v34, %v629_v31  ;;  %v909_v33 = vld [vmem:[#allocation6 + $0xc] sm:$0x3] }
 0x10c   : > { %1702 = vmatmul.mubr.msk.bf16.vlgmr.msra.gmra.mxu1 %vm422_vm5, %v563_v32 }
 0x10d   : > { %v640_v47 = vmul.f32 0.0625, %v638_v36  ;;  %v639_v38 = vmul.f32 0.0625, %v637_v37  ;;  %1706 = vmatpush3.bf16.msra.mxu1 %v656_v35  ;;  %1707 = vmatprep.mubr.msk.bf16.mxu1 %vm2064_vm3, %v2063_v42 }
 0x10e   : > { %v707_v46 = vpop.permute.xlu0 %706  ;;  %v705_v39 = vpop.permute.xlu1 %704  ;;  %1717 = vmatprep.subr.bf16.mxu1 %v2063_v42 }
 0x10f   : > { %v642_v40 = vpack.c.bf16 %v640_v47, %v640_v47  ;;  %v641_v41 = vpack.c.bf16 %v639_v38, %v639_v38  ;;  %v711_v0 = vadd.f32 %v707_v46, %v2310_v48  ;;  %v710_v48 = vadd.f32 %v705_v39, %v2312_v49 }
 0x110   : > { %v921_v47 = vsel %vm426_vm2, %v909_v33, 0 }
 0x111   : > { %v648_v43 = vunpack.c.l.b16 %v642_v40  ;;  %v647_v63 = vunpack.c.l.b16 %v641_v41 }
 0x112   : > { %v715_v52 = vpop.permute.xlu0 %714  ;;  %v795_v53 = vpop.permute.xlu1 %794 }
 0x113   : > { %v649_v62 = vrot.slane %v648_v43, 7  ;;  %v719_v5 = vadd.f32 %v715_v52, %v711_v0  ;;  %v799_v17 = vadd.f32 %v795_v53, %v2318_v50  ;;  %v997_v52 = vld [vmem:[#allocation6 + $0xe] sm:$0x3] }
 0x115   : > { %v650_v4 = vsel %vm419_vm4, %v649_v62, %v647_v63 }
 0x116   : > { %v651_v6 = vpack.c.b16 %v650_v4, %v650_v4  ;;  %v713_v7 = vpop.permute.xlu0 %712  ;;  %v723_v9 = vpop.permute.xlu1 %722  ;;  %v1009_v4 = vsel %vm426_vm2, %v997_v52, 0 }
 0x117   : > { %v727_v11 = vadd.f32 %v723_v9, %v719_v5  ;;  %v718_v14 = vadd.f32 %v713_v7, %v710_v48 }
 0x118   : > { %1708 = vmatmul.mubr.msk.bf16.vlgmr.msra.gmra.mxu1 %vm422_vm5, %v651_v6 }
 0x119   : > { %v729_v12 = vmul.f32 0.0625, %v727_v11  ;;  %1718 = vmatpush3.bf16.msra.mxu1 %v833_v10  ;;  %1719 = vmatprep.mubr.msk.bf16.mxu1 %vm2064_vm3, %v2063_v42 }
 0x11a   : > { %v793_v13 = vpop.permute.xlu0 %792  ;;  %v803_v45 = vpop.permute.xlu1 %802  ;;  %1729 = vmatprep.subr.bf16.mxu1 %v2063_v42 }
 0x11b   : > { %v731_v15 = vpack.c.bf16 %v729_v12, %v729_v12  ;;  %v798_v18 = vadd.f32 %v793_v13, %v2328_v51  ;;  %v807_v22 = vadd.f32 %v803_v45, %v799_v17 }
 0x11d   : > { %v737_v20 = vunpack.c.l.b16 %v731_v15 }
 0x11e   : > { %v721_v16 = vpop.permute.xlu0 %720  ;;  %v801_v44 = vpop.permute.xlu1 %800 }
 0x11f   : > { %v726_v19 = vadd.f32 %v721_v16, %v718_v14  ;;  %v806_v24 = vadd.f32 %v801_v44, %v798_v18  ;;  %v738_v30 = vrot.slane %v737_v20, 7 }
 0x121   : > { %v728_v23 = vmul.f32 0.0625, %v726_v19 }
 0x122   : > { %v811_v25 = vpop.permute.xlu0 %810  ;;  %v809_v26 = vpop.permute.xlu1 %808 }
 0x123   : > { %v730_v27 = vpack.c.bf16 %v728_v23, %v728_v23  ;;  %v815_v28 = vadd.f32 %v811_v25, %v807_v22  ;;  %v814_v29 = vadd.f32 %v809_v26, %v806_v24 }
 0x125   : > { %v736_v49 = vunpack.c.l.b16 %v730_v27  ;;  %v817_v31 = vmul.f32 0.0625, %v815_v28  ;;  %v816_v32 = vmul.f32 0.0625, %v814_v29  ;;  %v1086_v27 = vld [vmem:[#allocation6 + $0x10] sm:$0x3] }
 0x126   : > { %v883_v34 = vpop.permute.xlu0 %882  ;;  %v881_v35 = vpop.permute.xlu1 %880 }
 0x127   : > { %v739_v50 = vsel %vm419_vm4, %v738_v30, %v736_v49  ;;  %v819_v51 = vpack.c.bf16 %v817_v31, %v817_v31  ;;  %v818_v36 = vpack.c.bf16 %v816_v32, %v816_v32  ;;  %v887_v43 = vadd.f32 %v883_v34, %v2344_v54 }
 0x128   : > { %v740_v37 = vpack.c.b16 %v739_v50, %v739_v50  ;;  %v886_v9 = vadd.f32 %v881_v35, %v2346_v55  ;;  %v1098_v31 = vsel %vm426_vm2, %v1086_v27, 0 }
 0x129   : > { %v825_v38 = vunpack.c.l.b16 %v819_v51  ;;  %v824_v41 = vunpack.c.l.b16 %v818_v36  ;;  %v1174_v36 = vld [vmem:[#allocation6 + $0x12] sm:$0x3] }
 0x12a   : > { %v891_v46 = vpop.permute.xlu0 %890  ;;  %1714 = vmatmul.mubr.msk.bf16.vlgmr.msra.gmra.mxu0 %vm422_vm5, %v740_v37  ;;  %v971_v39 = vpop.permute.xlu1 %970 }
 0x12b   : > { %v826_v40 = vrot.slane %v825_v38, 7  ;;  %1724 = vmatpush3.bf16.msra.mxu0 %v921_v47  ;;  %1725 = vmatprep.mubr.msk.bf16.mxu0 %vm2064_vm3, %v2063_v42  ;;  %v895_v62 = vadd.f32 %v891_v46, %v887_v43  ;;  %v975_v45 = vadd.f32 %v971_v39, %v2352_v56 }
 0x12c   : > { %1735 = vmatprep.subr.bf16.mxu0 %v2063_v42 }
 0x12d   : > { %v827_v53 = vsel %vm419_vm4, %v826_v40, %v824_v41  ;;  %v1186_v40 = vsel %vm426_vm2, %v1174_v36, 0 }
 0x12e   : > { %v828_v63 = vpack.c.b16 %v827_v53, %v827_v53  ;;  %v889_v0 = vpop.permute.xlu0 %888  ;;  %v899_v3 = vpop.permute.xlu1 %898 }
 0x12f   : > { %v903_v5 = vadd.f32 %v899_v3, %v895_v62  ;;  %v894_v10 = vadd.f32 %v889_v0, %v886_v9 }
 0x130   : > { %1720 = vmatmul.mubr.msk.bf16.vlgmr.msra.gmra.mxu1 %vm422_vm5, %v828_v63 }
 0x131   : > { %v905_v6 = vmul.f32 0.0625, %v903_v5  ;;  %1730 = vmatpush3.bf16.msra.mxu1 %v1009_v4  ;;  %1731 = vmatprep.mubr.msk.bf16.mxu1 %vm2064_vm3, %v2063_v42 }
 0x132   : > { %v969_v54 = vpop.permute.xlu0 %968  ;;  %v979_v7 = vpop.permute.xlu1 %978  ;;  %1741 = vmatprep.subr.bf16.mxu1 %v2063_v42 }
 0x133   : > { %v907_v11 = vpack.c.bf16 %v905_v6, %v905_v6  ;;  %v974_v48 = vadd.f32 %v969_v54, %v2362_v57  ;;  %v983_v16 = vadd.f32 %v979_v7, %v975_v45 }
 0x135   : > { %v913_v15 = vunpack.c.l.b16 %v907_v11 }
 0x136   : > { %v897_v12 = vpop.permute.xlu0 %896  ;;  %v977_v13 = vpop.permute.xlu1 %976 }
 0x137   : > { %v902_v14 = vadd.f32 %v897_v12, %v894_v10  ;;  %v982_v17 = vadd.f32 %v977_v13, %v974_v48  ;;  %v914_v24 = vrot.slane %v913_v15, 7 }
 0x139   : > { %v904_v44 = vmul.f32 0.0625, %v902_v14 }
 0x13a   : > { %v987_v18 = vpop.permute.xlu0 %986  ;;  %v985_v19 = vpop.permute.xlu1 %984 }
 0x13b   : > { %v906_v20 = vpack.c.bf16 %v904_v44, %v904_v44  ;;  %v991_v22 = vadd.f32 %v987_v18, %v983_v16  ;;  %v990_v23 = vadd.f32 %v985_v19, %v982_v17  ;;  %v1262_v44 = vld [vmem:[#allocation6 + $0x14] sm:$0x3] }
 0x13d   : > { %v912_v55 = vunpack.c.l.b16 %v906_v20  ;;  %v993_v25 = vmul.f32 0.0625, %v991_v22  ;;  %v992_v26 = vmul.f32 0.0625, %v990_v23  ;;  %v1274_v22 = vsel %vm426_vm2, %v1262_v44, 0  ;;  %v1883_v44 = vld [vmem:[#allocation8 + $0x8] sm:$0xff]  }
 0x13e   : > { %v1060_v28 = vpop.permute.xlu0 %1059  ;;  %v1058_v29 = vpop.permute.xlu1 %1057 }
 0x13f   : > { %v915_v56 = vsel %vm419_vm4, %v914_v24, %v912_v55  ;;  %v995_v57 = vpack.c.bf16 %v993_v25, %v993_v25  ;;  %v994_v30 = vpack.c.bf16 %v992_v26, %v992_v26  ;;  %v1064_v51 = vadd.f32 %v1060_v28, %v2376_v58  ;;  %v1350_v28 = vld [vmem:[#allocation6 + $0x16] sm:$0x3] }
 0x140   : > { %v916_v49 = vpack.c.b16 %v915_v56, %v915_v56  ;;  %v1063_v53 = vadd.f32 %v1058_v29, %v2378_v59 }
 0x141   : > { %v1001_v32 = vunpack.c.l.b16 %v995_v57  ;;  %v1000_v50 = vunpack.c.l.b16 %v994_v30 }
 0x142   : > { %v1068_v33 = vpop.permute.xlu0 %1067  ;;  %1726 = vmatmul.mubr.msk.bf16.vlgmr.msra.gmra.mxu0 %vm422_vm5, %v916_v49  ;;  %v1148_v34 = vpop.permute.xlu1 %1147 }
 0x143   : > { %v1002_v35 = vrot.slane %v1001_v32, 7  ;;  %1736 = vmatpush3.bf16.msra.mxu0 %v1098_v31  ;;  %1737 = vmatprep.mubr.msk.bf16.mxu0 %vm2064_vm3, %v2063_v42  ;;  %v1072_v47 = vadd.f32 %v1068_v33, %v1064_v51  ;;  %v1152_v4 = vadd.f32 %v1148_v34, %v2384_v60  ;;  %v1362_v31 = vsel %vm426_vm2, %v1350_v28, 0 }
 0x144   : > { %1747 = vmatprep.subr.bf16.mxu0 %v2063_v42 }
 0x145   : > { %v1003_v37 = vsel %vm419_vm4, %v1002_v35, %v1000_v50 }
 0x146   : > { %v1004_v38 = vpack.c.b16 %v1003_v37, %v1003_v37  ;;  %v1066_v46 = vpop.permute.xlu0 %1065  ;;  %v1076_v39 = vpop.permute.xlu1 %1075 }
 0x147   : > { %v1080_v41 = vadd.f32 %v1076_v39, %v1072_v47  ;;  %v1071_v62 = vadd.f32 %v1066_v46, %v1063_v53 }
 0x148   : > { %1732 = vmatmul.mubr.msk.bf16.vlgmr.msra.gmra.mxu1 %vm422_vm5, %v1004_v38 }
 0x149   : > { %v1082_v43 = vmul.f32 0.0625, %v1080_v41  ;;  %1742 = vmatpush3.bf16.msra.mxu1 %v1186_v40  ;;  %1743 = vmatprep.mubr.msk.bf16.mxu1 %vm2064_vm3, %v2063_v42 }
 0x14a   : > { %v1146_v58 = vpop.permute.xlu0 %1145  ;;  %v1156_v52 = vpop.permute.xlu1 %1155  ;;  %1753 = vmatprep.subr.bf16.mxu1 %v2063_v42 }
 0x14b   : > { %v1084_v63 = vpack.c.bf16 %v1082_v43, %v1082_v43  ;;  %v1151_v5 = vadd.f32 %v1146_v58, %v2394_v61  ;;  %v1160_v7 = vadd.f32 %v1156_v52, %v1152_v4 }
 0x14d   : > { %v1090_v54 = vunpack.c.l.b16 %v1084_v63 }
 0x14e   : > { %v1074_v0 = vpop.permute.xlu0 %1073  ;;  %v1154_v3 = vpop.permute.xlu1 %1153 }
 0x14f   : > { %v1079_v6 = vadd.f32 %v1074_v0, %v1071_v62  ;;  %v1159_v10 = vadd.f32 %v1154_v3, %v1151_v5  ;;  %v1091_v14 = vrot.slane %v1090_v54, 7 }
 0x151   : > { %v1081_v9 = vmul.f32 0.0625, %v1079_v6 }
 0x152   : > { %v1164_v11 = vpop.permute.xlu0 %1163  ;;  %v1162_v12 = vpop.permute.xlu1 %1161 }
 0x153   : > { %v1083_v13 = vpack.c.bf16 %v1081_v9, %v1081_v9  ;;  %v1168_v45 = vadd.f32 %v1164_v11, %v1160_v7  ;;  %v1167_v48 = vadd.f32 %v1162_v12, %v1159_v10  ;;  %v1877_v12 = vld [vmem:[#allocation8 + $0x38] sm:$0xff]  }
 0x155   : > { %v1089_v59 = vunpack.c.l.b16 %v1083_v13  ;;  %v1170_v15 = vmul.f32 0.0625, %v1168_v45  ;;  %v1169_v16 = vmul.f32 0.0625, %v1167_v48  ;;  %v1878_v13 = vld [vmem:[#allocation8 + $0x30] sm:$0xff]   ;;  %v1879_v45 = vld [vmem:[#allocation8 + $0x28] sm:$0xff]   ;;  %v1880_v48 = vld [vmem:[#allocation8 + $0x20] sm:$0xff]  }
 0x156   : > { %v1236_v17 = vpop.permute.xlu0 %1235  ;;  %v1234_v18 = vpop.permute.xlu1 %1233 }
 0x157   : > { %v1092_v60 = vsel %vm419_vm4, %v1091_v14, %v1089_v59  ;;  %v1172_v61 = vpack.c.bf16 %v1170_v15, %v1170_v15  ;;  %v1171_v19 = vpack.c.bf16 %v1169_v16, %v1169_v16  ;;  %v1240_v27 = vadd.f32 %v1236_v17, %v2409_v1  ;;  %v1881_v14 = vld [vmem:[#allocation8 + $0x18] sm:$0xff]   ;;  %v1882_v59 = vld [vmem:[#allocation8 + $0x10] sm:$0xff]  }
 0x158   : > { %v1093_v20 = vpack.c.b16 %v1092_v60, %v1092_v60  ;;  %v1239_v35 = vadd.f32 %v1234_v18, %v2411_v2  ;;  %v1884_v60 = vld [vmem:[#allocation8] sm:$0xff]  }
 0x159   : > { %v1178_v23 = vunpack.c.l.b16 %v1172_v61  ;;  %v1177_v26 = vunpack.c.l.b16 %v1171_v19 }
 0x15a   : > { %v1244_v24 = vpop.permute.xlu0 %1243  ;;  %1738 = vmatmul.mubr.msk.bf16.vlgmr.msra.gmra.mxu0 %vm422_vm5, %v1093_v20  ;;  %v1324_v55 = vpop.permute.xlu1 %1323 }
 0x15b   : > { %v1179_v25 = vrot.slane %v1178_v23, 7  ;;  %1748 = vmatpush3.bf16.msra.mxu0 %v1274_v22  ;;  %1749 = vmatprep.mubr.msk.bf16.mxu0 %vm2064_vm3, %v2063_v42  ;;  %v1248_v56 = vadd.f32 %v1244_v24, %v1240_v27  ;;  %v1328_v37 = vadd.f32 %v1324_v55, %v2418_v8 }
 0x15c   : > { %1759 = vmatprep.subr.bf16.mxu0 %v2063_v42 }
 0x15d   : > { %v1180_v29 = vsel %vm419_vm4, %v1179_v25, %v1177_v26 }
 0x15e   : > { %v1181_v57 = vpack.c.b16 %v1180_v29, %v1180_v29  ;;  %v1242_v30 = vpop.permute.xlu0 %1241  ;;  %v1252_v49 = vpop.permute.xlu1 %1251 }
 0x15f   : > { %v1256_v32 = vadd.f32 %v1252_v49, %v1248_v56  ;;  %v1247_v50 = vadd.f32 %v1242_v30, %v1239_v35 }
 0x160   : > { %1744 = vmatmul.mubr.msk.bf16.vlgmr.msra.gmra.mxu1 %vm422_vm5, %v1181_v57 }
 0x161   : > { %v1258_v33 = vmul.f32 0.0625, %v1256_v32  ;;  %1754 = vmatpush3.bf16.msra.mxu1 %v1362_v31  ;;  %1755 = vmatprep.mubr.msk.bf16.mxu1 %vm2064_vm3, %v2063_v42 }
 0x162   : > { %v1322_v1 = vpop.permute.xlu0 %1321  ;;  %v1332_v34 = vpop.permute.xlu1 %1331 }
 0x163   : > { %v1260_v51 = vpack.c.bf16 %v1258_v33, %v1258_v33  ;;  %v1327_v46 = vadd.f32 %v1322_v1, %v2429_v21  ;;  %v1336_v40 = vadd.f32 %v1332_v34, %v1328_v37 }
 0x165   : > { %v1266_v39 = vunpack.c.l.b16 %v1260_v51 }
 0x166   : > { %v1250_v36 = vpop.permute.xlu0 %1249 }
 0x167   : > { %v1255_v47 = vadd.f32 %v1250_v36, %v1247_v50  ;;  %v1330_v38 = vpop.permute.xlu1 %1329  ;;  %v1267_v0 = vrot.slane %v1266_v39, 7 }
 0x168   : > { %v1335_v43 = vadd.f32 %v1330_v38, %v1327_v46 }
 0x169   : > { %v1257_v41 = vmul.f32 0.0625, %v1255_v47 }
 0x16a   : > { %v1340_v58 = vpop.permute.xlu0 %1339 }
 0x16b   : > { %v1259_v52 = vpack.c.bf16 %v1257_v41, %v1257_v41  ;;  %v1344_v53 = vadd.f32 %v1340_v58, %v1336_v40  ;;  %v1338_v62 = vpop.permute.xlu1 %1337 }
 0x16c   : > { %v1343_v63 = vadd.f32 %v1338_v62, %v1335_v43 }
 0x16d   : > { %v1265_v2 = vunpack.c.l.b16 %v1259_v52  ;;  %v1346_v3 = vmul.f32 0.0625, %v1344_v53 }
 0x16e   : > { %v1345_v4 = vmul.f32 0.0625, %v1343_v63 }
 0x16f   : > { %v1268_v5 = vsel %vm419_vm4, %v1267_v0, %v1265_v2  ;;  %v1348_v8 = vpack.c.bf16 %v1346_v3, %v1346_v3 }
 0x170   : > { %v1269_v6 = vpack.c.b16 %v1268_v5, %v1268_v5  ;;  %v1347_v54 = vpack.c.bf16 %v1345_v4, %v1345_v4 }
 0x171   : > { %v1354_v7 = vunpack.c.l.b16 %v1348_v8 }
 0x172   : > { %1750 = vmatmul.mubr.msk.bf16.vlgmr.msra.gmra.mxu0 %vm422_vm5, %v1269_v6  ;;  %v1353_v9 = vunpack.c.l.b16 %v1347_v54 }
 0x173   : > { %v1355_v21 = vrot.slane %v1354_v7, 7  ;;  %1775 = vmatprep.mubr.msk.bf16.mxu0 %vm2064_vm3, %v2063_v42  ;;  %1760 = vmatpush3.bf16.msra.mxu0 %v1877_v12 }
 0x174   : > { %1761 = vmatprep.subr.bf16.mxu0 %v2063_v42 }
 0x175   : > { %v1356_v10 = vsel %vm419_vm4, %v1355_v21, %v1353_v9 }
 0x176   : > { %v1357_v11 = vpack.c.b16 %v1356_v10, %v1356_v10 }
 0x177   : > { %1762 = vmatpush3.bf16.msra.mxu0 %v1878_v13 }
 0x178   : > { %1756 = vmatmul.mubr.msk.bf16.vlgmr.msra.gmra.mxu1 %vm422_vm5, %v1357_v11  ;;  %1763 = vmatprep.subr.bf16.mxu0 %v2063_v42  ;;  %v1640_v11 = vld [vmem:[%s2579_s2] ss:$0 sm:$0xff] }
 0x17b   : > { %1764 = vmatpush3.bf16.msra.mxu0 %v1879_v45 }
 0x17c   : > { %1765 = vmatprep.subr.bf16.mxu0 %v2063_v42 }
 0x17f   : > { %1766 = vmatpush3.bf16.msra.mxu0 %v1880_v48 }
 0x180   : > { %1767 = vmatprep.subr.bf16.mxu0 %v2063_v42 }
 0x183   : > { %1768 = vmatpush3.bf16.msra.mxu0 %v1881_v14 }
 0x184   : > { %1769 = vmatprep.subr.bf16.mxu0 %v2063_v42 }
 0x187   : > { %1770 = vmatpush3.bf16.msra.mxu0 %v1882_v59 }
 0x188   : > { %1771 = vmatprep.subr.bf16.mxu0 %v2063_v42 }
 0x18b   : > { %1772 = vmatpush3.bf16.msra.mxu0 %v1883_v44 }
 0x18c   : > { %1773 = vmatprep.subr.bf16.mxu0 %v2063_v42 }
 0x18f   : > { %1774 = vmatpush3.bf16.msra.mxu0 %v1884_v60 }
 0x1b4   : > { %v464_v15 = vpop.f32.mrf.mxu1 }
 0x1b6   : > { %v1691_v16 = vpop.f32.mrf.mxu1 }
 0x1b8   : > { %v467_v17 = vpop.f32.mrf.mxu1 }
 0x1ba   : > { %v1692_v18 = vpop.f32.mrf.mxu1 }
 0x1c0   : > { %v517_v61 = vpop.f32.mrf.mxu1 }
 0x1c1   : > { %v518_v19 = vadd.f32 %v517_v61, %v464_v15  ;;  %v1641_v15 = vld [vmem:[%s2581_s4] ss:$0 sm:$0xff] }
 0x1c2   : > { %v1697_v20 = vpop.f32.mrf.mxu1 }
 0x1c4   : > { %v520_v22 = vpop.f32.mrf.mxu1 }
 0x1c6   : > { %v1698_v23 = vpop.f32.mrf.mxu1 }
 0x1cc   : > { %v604_v24 = vpop.f32.mrf.mxu1 }
 0x1cd   : > { %v610_v55 = vadd.f32 %v604_v24, %v518_v19 }
 0x1ce   : > { %v1703_v25 = vpop.f32.mrf.mxu1 }
 0x1d0   : > { %v607_v26 = vpop.f32.mrf.mxu1 }
 0x1d2   : > { %v1704_v27 = vpop.f32.mrf.mxu1 }
 0x1d8   : > { %v692_v28 = vpop.f32.mrf.mxu1 }
 0x1d9   : > { %v698_v29 = vadd.f32 %v692_v28, %v610_v55 }
 0x1da   : > { %v1709_v56 = vpop.f32.mrf.mxu1 }
 0x1dc   : > { %v695_v57 = vpop.f32.mrf.mxu1 }
 0x1de   : > { %v1710_v30 = vpop.f32.mrf.mxu1 }
 0x1ea   : > { %v781_v49 = vpop.f32.mrf.mxu0 }
 0x1eb   : > { %v787_v31 = vadd.f32 %v781_v49, %v698_v29 }
 0x1ec   : > { %v1715_v42 = vpop.f32.mrf.mxu0 }
 0x1ee   : > { %v784_v32 = vpop.f32.mrf.mxu0 }
 0x1f0   : > { %v1716_v33 = vpop.f32.mrf.mxu0  ;;  %v869_v1 = vpop.f32.mrf.mxu1 }
 0x1f1   : > { %v875_v2 = vadd.f32 %v869_v1, %v787_v31 }
 0x1f2   : > { %v1721_v34 = vpop.f32.mrf.mxu1 }
 0x1f4   : > { %v872_v35 = vpop.f32.mrf.mxu1 }
 0x1f6   : > { %v1722_v50 = vpop.f32.mrf.mxu1 }
 0x202   : > { %v957_v51 = vpop.f32.mrf.mxu0 }
 0x203   : > { %v963_v3 = vadd.f32 %v957_v51, %v875_v2 }
 0x204   : > { %v1727_v36 = vpop.f32.mrf.mxu0 }
 0x206   : > { %v960_v37 = vpop.f32.mrf.mxu0 }
 0x208   : > { %v1728_v47 = vpop.f32.mrf.mxu0  ;;  %v1045_v38 = vpop.f32.mrf.mxu1 }
 0x209   : > { %v1051_v4 = vadd.f32 %v1045_v38, %v963_v3 }
 0x20a   : > { %v1733_v46 = vpop.f32.mrf.mxu1 }
 0x20c   : > { %v1048_v39 = vpop.f32.mrf.mxu1 }
 0x20e   : > { %v1734_v40 = vpop.f32.mrf.mxu1 }
 0x21a   : > { %v1134_v41 = vpop.f32.mrf.mxu0 }
 0x21b   : > { %v1140_v8 = vadd.f32 %v1134_v41, %v1051_v4 }
 0x21c   : > { %v1739_v43 = vpop.f32.mrf.mxu0 }
 0x21e   : > { %v1137_v58 = vpop.f32.mrf.mxu0 }
 0x220   : > { %v1740_v52 = vpop.f32.mrf.mxu0  ;;  %v1222_v53 = vpop.f32.mrf.mxu1 }
 0x221   : > { %v1228_v54 = vadd.f32 %v1222_v53, %v1140_v8 }
 0x222   : > { %v1745_v62 = vpop.f32.mrf.mxu1 }
 0x224   : > { %v1225_v63 = vpop.f32.mrf.mxu1 }
 0x226   : > { %v1746_v0 = vpop.f32.mrf.mxu1 }
 0x232   : > { %v1310_v5 = vpop.f32.mrf.mxu0 }
 0x233   : > { %v1316_v21 = vadd.f32 %v1310_v5, %v1228_v54 }
 0x234   : > { %v1751_v6 = vpop.f32.mrf.mxu0 }
 0x236   : > { %v1313_v7 = vpop.f32.mrf.mxu0 }
 0x238   : > { %v1752_v9 = vpop.f32.mrf.mxu0  ;;  %v1398_v10 = vpop.f32.mrf.mxu1 }
 0x239   : > { %v1404_v12 = vadd.f32 %v1398_v10, %v1316_v21 }
 0x23a   : > { %v1757_v13 = vpop.f32.mrf.mxu1 }
 0x23b   : > { %v1412_v45 = vadd.f32 %v1640_v11, %v1404_v12 }
 0x23c   : > { %v1401_v48 = vpop.f32.mrf.mxu1 }
 0x23d   : > { %v1413_v14 = vpack.c.bf16 %v1412_v45, %v1412_v45 }
 0x23e   : > { %v1758_v59 = vpop.f32.mrf.mxu1 }
 0x23f   : > { %1776 = vmatmul.mubr.bf16.vlgmr.msra.gmra.mxu0 %v1413_v14 }
 0x2ff   : > { %v1519_v16 = vpop.f32.mrf.mxu0 }
 0x300   : > { %v1520_v44 = vadd.f32 %v1641_v15, %v1519_v16 }
 0x301   : > { %v1777_v17 = vpop.f32.mrf.mxu0 }
 0x302   : > { %1525 = vst [vmem:[#allocation9] sm:$0x3] %v1520_v44 }
 0x303   : > { %v1522_v18 = vpop.f32.mrf.mxu0 }
 0x305   : > { %v1778_v60 = vpop.f32.mrf.mxu0 }
 0x306 PF: > { %s2592_s15 = sadd.s32 4294967295, %s2047_s23   ;;  %s2065_s17 = smov [#allocation9]  }
 0x307   : > { %p2544_p12 = scmp.eq.s32.totalorder %s2592_s15, 1  ;;  %s1535_s18 = sshll.u32 %s2065_s17, 4  ;;  %s1536_s18 = int_to_ptr.vmem [resolvable:$true] %s1535_s18 }
 0x308   : > { %s1965_s10 = scalar_lea.vmem %s1536_s18, 32  ;;  %p1972_p9 = scmp.lt.s32.totalorder %s1536_s18, %s1536_s18 }
 0x309   : > { %p1966_p13 = scmp.ne.s32.totalorder %s1536_s18, %s1965_s10  ;;  %p1973_p5 = scmp.lt.s32.totalorder %s1965_s10, %s1965_s10 }
 0x30b   : > { %p1967_p6 = pnand %p1966_p13, %p2544_p12  ;;  %p1974_p11 = por %p1973_p5, %p1972_p9 }
 0x30d   : > { %p1968_p10 = pneg %p1967_p6 }
 0x30f   : > { %p1975_p0 = pnand %p1974_p11, %p1968_p10 }
 0x311   : > { %1978 = shalt.err (!%p1975_p0)
}
 0x312   : > { %1792 = dma.vmem_to_hbm [thread:$0]  (%p2544_p12), %s1536_s18, 32, %s2582_s5, [#allocation5]  }
 0x313   : > { %2022 = dma.done.wait (%p2544_p12), [#allocation5], 32  }
 0x314   : > { %2024 = vsyncadd (%p2544_p12), [#allocation5], 4294967264 }
 0x315 PF: > { %s20_s23 = sadd.s32 1, %s2047_s23   ;;  %s2594_s18 = smov %s2031_s19 }
 0x316   : > { %p17_p1 = scmp.ge.s32.totalorder %s20_s23, 4   ;;  %s2595_s19 = smov %s2035_s20 }
 0x317   : > { %s2596_s20 = smov %s2192_s13  ;;  %s2597_s21 = smov %s2043_s22 }
 0x318   : > { %s2598_s22 = smov %s2600_s7  ;;  %19 = sbr.rel (!%p17_p1) target bundleno = 6 (0x6), region = 107 }
 0x31d   :  { %1548 = vsyncpa [#allocation4], 1 }
 0x31e   :  { %1550 = vsyncpa [#allocation4 + $0x1], 1 }
 0x31f   :  { %1551 = vsyncpa [#allocation7], 1 }
 0x320   :  { %1552 = vsyncpa [#allocation5], 1 }
 0x321   :  { %1554 = vsyncpa [#allocation5 + $0x1], 1 }

</bundles_post_ra>
